<compile_context>
chip_gen: v5e
topology: v5e:2x2
jax: 0.10.0
libtpu: 0.0.40
codegen_flags: <defaults>
</compile_context>

<pallas_src>
import functools

import jax
import jax.numpy as jnp
import numpy as np
from jax import lax
from jax.experimental import pallas as pl
from jax.experimental.pallas import tpu as pltpu


def split_int_into_n(i, n):
    r = i % n
    o = i // n
    return [o + 1 if j < r else o for j in range(n)]


def _resnext_kernel(*refs, D, H, W, K, P, CI, TILE, PADL, skip_conv, use_im2col):
    xl_ref, xc_ref, xr_ref, coord_ref = refs[:4]
    w1_ref, b1_ref, w2_ref, b2_ref, w3_ref, b3_ref = refs[4:10]
    i = 10
    if skip_conv:
        ws_ref, bs_ref = refs[i:i + 2]
        i += 2
    out_ref = refs[i]
    ybuf_ref = refs[i + 1]
    col_ref = refs[i + 2] if use_im2col else None

    cdt = ybuf_ref.dtype          # compute dtype (f32 or bf16)
    HW = H * W

    xc = xc_ref[...]
    # Fused branch-entry 1x1x1 convs (all branches): center tile plus the
    # +-PADL halo, recomputed from the neighbouring x blocks (cheap: K=Cin).
    y1c = jnp.dot(w1_ref[...], xc, preferred_element_type=jnp.float32) + b1_ref[...]
    y1l = jnp.dot(w1_ref[...], xl_ref[:, TILE - PADL:],
                  preferred_element_type=jnp.float32) + b1_ref[...]
    y1r = jnp.dot(w1_ref[...], xr_ref[:, :PADL],
                  preferred_element_type=jnp.float32) + b1_ref[...]
    # All stores below are 128-lane aligned (PADL and TILE are multiples of 128).
    ybuf_ref[:, :PADL] = y1l.astype(cdt)
    ybuf_ref[:, PADL:PADL + TILE] = y1c.astype(cdt)
    ybuf_ref[:, PADL + TILE:] = y1r.astype(cdt)

    # Per-lane (d, h, w) coordinates of this tile's OUTPUT positions.
    d = coord_ref[0:1, :]
    h = coord_ref[1:2, :]
    w = coord_ref[2:3, :]

    def tap_valid(dd, dh, dw):
        conds = []
        if dd < 0:
            conds.append(d >= -dd)
        if dd > 0:
            conds.append(d < D - dd)
        if dh < 0:
            conds.append(h >= -dh)
        if dh > 0:
            conds.append(h < H - dh)
        if dw < 0:
            conds.append(w >= -dw)
        if dw > 0:
            conds.append(w < W - dw)
        v = conds[0]
        for cnd in conds[1:]:
            v = v & cnd
        return v

    def shifted_tap(dd, dh, dw):
        off = dd * HW + dh * W + dw                    # static lane shift
        sh = ybuf_ref[:, PADL + off:PADL + off + TILE]
        if (dd, dh, dw) != (0, 0, 0):
            # Zero contributions that would cross a D/H/W border (also blocks
            # any cross-volume leakage from the batch-folded lane axis).
            sh = jnp.where(tap_valid(dd, dh, dw), sh, jnp.zeros((), cdt))
        return sh

    taps = [(kd - P, kh - P, kw - P)
            for kd in range(K) for kh in range(K) for kw in range(K)]

    if use_im2col:
        # (K^3*CI, TILE) column matrix -> a single grouped-conv matmul with
        # contraction K^3*CI (pays off when CI is small).
        for t, (dd, dh, dw) in enumerate(taps):
            col_ref[t * CI:(t + 1) * CI, :] = shifted_tap(dd, dh, dw)
        acc = jnp.dot(w2_ref[...], col_ref[...],
                      preferred_element_type=jnp.float32) + b2_ref[...]
    else:
        # Per-tap accumulating matmuls (contraction = CI each); no im2col slab
        # is ever written or re-read through VMEM.
        acc = jnp.zeros((CI, TILE), jnp.float32)
        for t, (dd, dh, dw) in enumerate(taps):
            acc = acc + jnp.dot(w2_ref[:, t * CI:(t + 1) * CI],
                                shifted_tap(dd, dh, dw),
                                preferred_element_type=jnp.float32)
        acc = acc + b2_ref[...]

    # Fused (branch-summed) exit 1x1x1 convs.
    y3 = jnp.dot(w3_ref[...], acc.astype(cdt),
                 preferred_element_type=jnp.float32) + b3_ref[...]

    # Skip path: real conv only when Cin != Cout, otherwise add x directly.
    if skip_conv:
        skip = jnp.dot(ws_ref[...], xc, preferred_element_type=jnp.float32) + bs_ref[...]
    else:
        skip = xc.astype(jnp.float32)

    out_ref[...] = (y3 + skip).astype(out_ref.dtype)   # lane-dense store


def _build_coords(N, D, H, W, L_pad):
    """int32 (8, L_pad): rows 0..2 hold (d, h, w) of each folded lane."""
    DHW = D * H * W
    p = np.arange(N * DHW) % DHW
    coords = np.zeros((8, L_pad), np.int32)
    coords[0, :N * DHW] = p // (H * W)
    coords[1, :N * DHW] = (p // W) % H
    coords[2, :N * DHW] = p % W
    return jnp.asarray(coords)


def resnext_block3d(x, fused, *, tile_lanes=512, compute_dtype=jnp.float32,
                    use_im2col=None):
    """x: (N, Cin, D, H, W) float32 (PyTorch NCDHW layout)."""
    N, Cin, D, H, W = x.shape
    K = fused["K"]
    assert K % 2 == 1, "padding='same' fast path assumes odd kernel size"
    P = (K - 1) // 2
    CI = fused["w1"].shape[0]
    Cout = fused["w3"].shape[0]
    DHW = D * H * W
    L = N * DHW
    max_off = P * (H * W + W + 1)
    PADL = ((max_off + 127) // 128) * 128              # 128-aligned halo width
    TILE = max(((tile_lanes + 127) // 128) * 128, PADL)
    L_pad = ((L + TILE - 1) // TILE) * TILE
    ntiles = L_pad // TILE
    skip_conv = fused["wskip"] is not None
    if use_im2col is None:
        use_im2col = CI < 128      # im2col only pays when CI is small vs MXU depth

    # Channels-first, batch folded into the lane axis (lane-dense), tail-padded
    # to a multiple of TILE and flanked by one zero TILE per side (halo blocks).
    x_cf = jnp.transpose(x, (1, 0, 2, 3, 4)).reshape(Cin, L).astype(compute_dtype)
    x_pad = jnp.pad(x_cf, ((0, 0), (TILE, TILE + (L_pad - L))))

    coords = _build_coords(N, D, H, W, L_pad)

    w1 = fused["w1"].astype(compute_dtype)
    w2 = fused["w2"].astype(compute_dtype)
    w3 = fused["w3"].astype(compute_dtype)
    b1, b2, b3 = fused["b1"], fused["b2"], fused["b3"]

    kern = functools.partial(_resnext_kernel, D=D, H=H, W=W, K=K, P=P, CI=CI,
                             TILE=TILE, PADL=PADL, skip_conv=skip_conv,
                             use_im2col=use_im2col)

    def const_spec(arr):
        nd = arr.ndim
        return pl.BlockSpec(arr.shape, lambda j, _nd=nd: (0,) * _nd)

    in_specs = [
        pl.BlockSpec((Cin, TILE), lambda j: (0, j)),        # left-halo block
        pl.BlockSpec((Cin, TILE), lambda j: (0, j + 1)),    # center block
        pl.BlockSpec((Cin, TILE), lambda j: (0, j + 2)),    # right-halo block
        pl.BlockSpec((8, TILE), lambda j: (0, j)),          # (d,h,w) lane coords
        const_spec(w1), const_spec(b1), const_spec(w2), const_spec(b2),
        const_spec(w3), const_spec(b3),
    ]
    args = [x_pad, x_pad, x_pad, coords, w1, b1, w2, b2, w3, b3]
    if skip_conv:
        ws = fused["wskip"].astype(compute_dtype)
        bs = fused["bskip"]
        in_specs += [const_spec(ws), const_spec(bs)]
        args += [ws, bs]

    scratch = [pltpu.VMEM((CI, PADL + TILE + PADL), compute_dtype)]  # shifted-read buf
    if use_im2col:
        scratch.append(pltpu.VMEM((K * K * K * CI, TILE), compute_dtype))

    out_flat = pl.pallas_call(
        kern,
        out_shape=jax.ShapeDtypeStruct((Cout, L_pad), x.dtype),
        grid_spec=pltpu.PrefetchScalarGridSpec(
            num_scalar_prefetch=0,
            grid=(ntiles,),
            in_specs=in_specs,
            out_specs=pl.BlockSpec((Cout, TILE), lambda j: (0, j)),
            scratch_shapes=scratch,
        ),
        compiler_params=pltpu.CompilerParams(
            dimension_semantics=("parallel",)),
        # NOTE: at production sizes (CI>=128, TILE>=2048) raise vmem_limit_bytes
        # in CompilerParams; the test shapes fit the default scoped VMEM.
    )(*args)

    out = out_flat[:, :L].reshape(Cout, N, DHW)
    return jnp.transpose(out, (1, 0, 2)).reshape(N, Cout, D, H, W)


def fuse_params(branches, splits, K, CI, wskip, bskip):
    """Fold the per-branch ResNeXt weights into the fused kernel weights."""
    KKK = K * K * K
    w1m = jnp.concatenate([br["w1"].T for br in branches], axis=0)          # (CI, Cin)
    b1v = jnp.concatenate([br["b1"] for br in branches])[:, None]           # (CI, 1)
    w2bd = jnp.zeros((KKK, CI, CI), jnp.float32)                            # block-diag
    off = 0
    for br, s in zip(branches, splits):
        w2bd = w2bd.at[:, off:off + s, off:off + s].set(br["w2"].reshape(KKK, s, s))
        off += s
    w2m = jnp.transpose(w2bd, (2, 0, 1)).reshape(CI, KKK * CI)              # (CI, K^3*CI)
    b2v = jnp.concatenate([br["b2"] for br in branches])[:, None]           # (CI, 1)
    w3m = jnp.concatenate([br["w3"].T for br in branches], axis=1)          # (Cout, CI)
    b3v = sum(br["b3"] for br in branches)[:, None]                         # (Cout, 1)
    fused = dict(K=K, w1=w1m, b1=b1v, w2=w2m, b2=b2v, w3=w3m, b3=b3v)
    fused["wskip"] = None if wskip is None else wskip.T                     # (Cout, Cin)
    fused["bskip"] = None if bskip is None else bskip[:, None]              # (Cout, 1)
    return fused


def ref_forward(x, branches, wskip, bskip):
    """Independent pure-JAX reference mirroring the per-branch PyTorch forward."""
    outs = None
    for br in branches:
        y = jnp.einsum("ncdhw,ck->nkdhw", x, br["w1"]) + br["b1"][None, :, None, None, None]
        y = lax.conv_general_dilated(
            y, br["w2"], window_strides=(1, 1, 1), padding="SAME",
            dimension_numbers=("NCDHW", "DHWIO", "NCDHW"))
        y = y + br["b2"][None, :, None, None, None]
        y = jnp.einsum("ncdhw,ck->nkdhw", y, br["w3"]) + br["b3"][None, :, None, None, None]
        outs = y if outs is None else outs + y
    if wskip is not None:
        skip = jnp.einsum("ncdhw,ck->nkdhw", x, wskip) + bskip[None, :, None, None, None]
    else:
        skip = x
    return outs + skip


def run_case(key, *, N, Cin, CI, Cout, K, D, H, W, n_splits,
             compute_dtype, use_im2col, tol):
    splits = split_int_into_n(CI, n_splits)
    keys = iter(jax.random.split(key, 6 * n_splits + 3))

    def nrm(shape, scale=0.2):
        return scale * jax.random.normal(next(keys), shape, jnp.float32)

    branches = []
    for s in splits:
        branches.append(dict(
            w1=nrm((Cin, s)), b1=nrm((s,)),
            w2=nrm((K, K, K, s, s)), b2=nrm((s,)),
            w3=nrm((s, Cout)), b3=nrm((Cout,)),
        ))
    if Cin != Cout:
        wskip, bskip = nrm((Cin, Cout)), nrm((Cout,))
    else:
        wskip, bskip = None, None               # identity skip: added in-kernel

    x = jax.random.normal(next(keys), (N, Cin, D, H, W), jnp.float32)
    fused = fuse_params(branches, splits, K, CI, wskip, bskip)

    out = jax.block_until_ready(
        resnext_block3d(x, fused, compute_dtype=compute_dtype,
                        use_im2col=use_im2col))
    ref = jax.block_until_ready(ref_forward(x, branches, wskip, bskip))
    np.testing.assert_allclose(np.asarray(out), np.asarray(ref), rtol=tol, atol=tol)


if __name__ == "__main__":
    key = jax.random.PRNGKey(0)
    k1, k2 = jax.random.split(key)

    # Case A: identity skip (Cin == Cout), im2col path (CI small), f32 compute,
    # two lane tiles across the batch-folded spatial axis.
    run_case(k1, N=2, Cin=4, CI=8, Cout=4, K=3, D=8, H=8, W=8, n_splits=4,
             compute_dtype=jnp.float32, use_im2col=True, tol=2e-2)

    # Case B: conv skip (Cin != Cout), per-tap-accumulate path, bf16 compute
    # with f32 accumulation, non-power-of-two volume with a masked lane tail.
    run_case(k2, N=2, Cin=4, CI=8, Cout=6, K=3, D=6, H=6, W=6, n_splits=4,
             compute_dtype=jnp.bfloat16, use_im2col=False, tol=1e-1)

    print("KERNEL_OK")
</pallas_src>

<mosaic_0001>
module attributes {stable_mosaic.version = 11 : i64} {
  func.func @_resnext_kernel(%arg0: i32, %arg1: memref<4x512xf32, #tpu.memory_space<vmem>>, %arg2: memref<4x512xf32, #tpu.memory_space<vmem>>, %arg3: memref<4x512xf32, #tpu.memory_space<vmem>>, %arg4: memref<8x512xi32, #tpu.memory_space<vmem>>, %arg5: memref<8x4xf32, #tpu.memory_space<vmem>>, %arg6: memref<8x1xf32, #tpu.memory_space<vmem>>, %arg7: memref<8x216xf32, #tpu.memory_space<vmem>>, %arg8: memref<8x1xf32, #tpu.memory_space<vmem>>, %arg9: memref<4x8xf32, #tpu.memory_space<vmem>>, %arg10: memref<4x1xf32, #tpu.memory_space<vmem>>, %arg11: memref<4x512xf32, #tpu.memory_space<vmem>>, %arg12: memref<8x768xf32, #tpu.memory_space<vmem>>, %arg13: memref<216x512xf32, #tpu.memory_space<vmem>>) attributes {dimension_semantics = [#tpu.dimension_semantics<parallel>], iteration_bounds = array<i64: 2>, scalar_prefetch = 0 : i64, scratch_operands = 2 : i64, tpu.core_type = #tpu.core_type<tc>, window_params = [{transform_indices = @transform_0, window_bounds = array<i64: 4, 512>}, {transform_indices = @transform_1, window_bounds = array<i64: 4, 512>}, {transform_indices = @transform_2, window_bounds = array<i64: 4, 512>}, {transform_indices = @transform_3, window_bounds = array<i64: 8, 512>}, {pipeline_mode = #tpu.pipeline_mode<synchronous>, transform_indices = @transform_4, window_bounds = array<i64: 8, 4>}, {pipeline_mode = #tpu.pipeline_mode<synchronous>, transform_indices = @transform_5, window_bounds = array<i64: 8, 1>}, {pipeline_mode = #tpu.pipeline_mode<synchronous>, transform_indices = @transform_6, window_bounds = array<i64: 8, 216>}, {pipeline_mode = #tpu.pipeline_mode<synchronous>, transform_indices = @transform_7, window_bounds = array<i64: 8, 1>}, {pipeline_mode = #tpu.pipeline_mode<synchronous>, transform_indices = @transform_8, window_bounds = array<i64: 4, 8>}, {pipeline_mode = #tpu.pipeline_mode<synchronous>, transform_indices = @transform_9, window_bounds = array<i64: 4, 1>}, {transform_indices = @transform_10, window_bounds = array<i64: 4, 512>}]} {
    %c0 = arith.constant 0 : index
    %c0_0 = arith.constant 0 : index
    %0 = vector.load %arg2[%c0, %c0_0] : memref<4x512xf32, #tpu.memory_space<vmem>>, vector<4x512xf32>
    %c0_1 = arith.constant 0 : index
    %c0_2 = arith.constant 0 : index
    %1 = vector.load %arg5[%c0_1, %c0_2] : memref<8x4xf32, #tpu.memory_space<vmem>>, vector<8x4xf32>
    %cst = arith.constant dense<0.000000e+00> : vector<8x512xf32>
    %2 = tpu.matmul %1, %0, %cst {dimension_numbers = #tpu.dot_dimension_numbers<[1], [0], [0], [1], [0, 0, 1, 1], [], []>} : vector<8x4xf32>, vector<4x512xf32>, vector<8x512xf32> -> vector<8x512xf32>
    %c0_3 = arith.constant 0 : index
    %c0_4 = arith.constant 0 : index
    %3 = vector.load %arg6[%c0_3, %c0_4] : memref<8x1xf32, #tpu.memory_space<vmem>>, vector<8x1xf32>
    %4 = vector.broadcast %3 : vector<8x1xf32> to vector<8x512xf32>
    %5 = arith.addf %2, %4 : vector<8x512xf32>
    %c0_5 = arith.constant 0 : index
    %c0_6 = arith.constant 0 : index
    %6 = vector.load %arg5[%c0_5, %c0_6] : memref<8x4xf32, #tpu.memory_space<vmem>>, vector<8x4xf32>
    %c0_7 = arith.constant 0 : index
    %c384 = arith.constant 384 : index
    %7 = vector.load %arg1[%c0_7, %c384] : memref<4x512xf32, #tpu.memory_space<vmem>>, vector<4x128xf32>
    %cst_8 = arith.constant dense<0.000000e+00> : vector<8x128xf32>
    %8 = tpu.matmul %6, %7, %cst_8 {dimension_numbers = #tpu.dot_dimension_numbers<[1], [0], [0], [1], [0, 0, 1, 1], [], []>} : vector<8x4xf32>, vector<4x128xf32>, vector<8x128xf32> -> vector<8x128xf32>
    %c0_9 = arith.constant 0 : index
    %c0_10 = arith.constant 0 : index
    %9 = vector.load %arg6[%c0_9, %c0_10] : memref<8x1xf32, #tpu.memory_space<vmem>>, vector<8x1xf32>
    %10 = vector.broadcast %9 : vector<8x1xf32> to vector<8x128xf32>
    %11 = arith.addf %8, %10 : vector<8x128xf32>
    %c0_11 = arith.constant 0 : index
    %c0_12 = arith.constant 0 : index
    %12 = vector.load %arg5[%c0_11, %c0_12] : memref<8x4xf32, #tpu.memory_space<vmem>>, vector<8x4xf32>
    %c0_13 = arith.constant 0 : index
    %c0_14 = arith.constant 0 : index
    %13 = vector.load %arg3[%c0_13, %c0_14] : memref<4x512xf32, #tpu.memory_space<vmem>>, vector<4x128xf32>
    %cst_15 = arith.constant dense<0.000000e+00> : vector<8x128xf32>
    %14 = tpu.matmul %12, %13, %cst_15 {dimension_numbers = #tpu.dot_dimension_numbers<[1], [0], [0], [1], [0, 0, 1, 1], [], []>} : vector<8x4xf32>, vector<4x128xf32>, vector<8x128xf32> -> vector<8x128xf32>
    %c0_16 = arith.constant 0 : index
    %c0_17 = arith.constant 0 : index
    %15 = vector.load %arg6[%c0_16, %c0_17] : memref<8x1xf32, #tpu.memory_space<vmem>>, vector<8x1xf32>
    %16 = vector.broadcast %15 : vector<8x1xf32> to vector<8x128xf32>
    %17 = arith.addf %14, %16 : vector<8x128xf32>
    %c0_18 = arith.constant 0 : index
    %c0_19 = arith.constant 0 : index
    %18 = vector.load %arg12[%c0_18, %c0_19] : memref<8x768xf32, #tpu.memory_space<vmem>>, vector<8x128xf32>
    tpu.vector_store %arg12[%c0_18, %c0_19], %11 {strides = array<i32>} : memref<8x768xf32, #tpu.memory_space<vmem>>, vector<8x128xf32>,
    %c0_20 = arith.constant 0 : index
    %c128 = arith.constant 128 : index
    %19 = vector.load %arg12[%c0_20, %c128] : memref<8x768xf32, #tpu.memory_space<vmem>>, vector<8x512xf32>
    tpu.vector_store %arg12[%c0_20, %c128], %5 {strides = array<i32>} : memref<8x768xf32, #tpu.memory_space<vmem>>, vector<8x512xf32>,
    %c0_21 = arith.constant 0 : index
    %c640 = arith.constant 640 : index
    %20 = vector.load %arg12[%c0_21, %c640] : memref<8x768xf32, #tpu.memory_space<vmem>>, vector<8x128xf32>
    tpu.vector_store %arg12[%c0_21, %c640], %17 {strides = array<i32>} : memref<8x768xf32, #tpu.memory_space<vmem>>, vector<8x128xf32>,
    %c0_22 = arith.constant 0 : index
    %c0_23 = arith.constant 0 : index
    %21 = vector.load %arg4[%c0_22, %c0_23] : memref<8x512xi32, #tpu.memory_space<vmem>>, vector<1x512xi32>
    %c1 = arith.constant 1 : index
    %c0_24 = arith.constant 0 : index
    %22 = vector.load %arg4[%c1, %c0_24] : memref<8x512xi32, #tpu.memory_space<vmem>>, vector<1x512xi32>
    %c2 = arith.constant 2 : index
    %c0_25 = arith.constant 0 : index
    %23 = vector.load %arg4[%c2, %c0_25] : memref<8x512xi32, #tpu.memory_space<vmem>>, vector<1x512xi32>
    %c0_26 = arith.constant 0 : index
    %c55 = arith.constant 55 : index
    %24 = vector.load %arg12[%c0_26, %c55] : memref<8x768xf32, #tpu.memory_space<vmem>>, vector<8x512xf32>
    %c1_i32 = arith.constant 1 : i32
    %25 = vector.broadcast %c1_i32 : i32 to vector<1x512xi32>
    %26 = arith.cmpi sge, %21, %25 : vector<1x512xi32>
    %c1_i32_27 = arith.constant 1 : i32
    %27 = vector.broadcast %c1_i32_27 : i32 to vector<1x512xi32>
    %28 = arith.cmpi sge, %22, %27 : vector<1x512xi32>
    %c1_i32_28 = arith.constant 1 : i32
    %29 = vector.broadcast %c1_i32_28 : i32 to vector<1x512xi32>
    %30 = arith.cmpi sge, %23, %29 : vector<1x512xi32>
    %31 = arith.andi %26, %28 : vector<1x512xi1>
    %32 = arith.andi %31, %30 : vector<1x512xi1>
    %cst_29 = arith.constant 0.000000e+00 : f32
    %33 = vector.shape_cast %32 : vector<1x512xi1> to vector<1x512xi1>
    %34 = vector.broadcast %33 : vector<1x512xi1> to vector<8x512xi1>
    %35 = vector.broadcast %cst_29 : f32 to vector<8x512xf32>
    %36 = arith.select %34, %24, %35 : vector<8x512xi1>, vector<8x512xf32>
    %c0_30 = arith.constant 0 : index
    %c0_31 = arith.constant 0 : index
    %37 = vector.load %arg13[%c0_30, %c0_31] : memref<216x512xf32, #tpu.memory_space<vmem>>, vector<8x512xf32>
    tpu.vector_store %arg13[%c0_30, %c0_31], %36 {strides = array<i32>} : memref<216x512xf32, #tpu.memory_space<vmem>>, vector<8x512xf32>,
    %c0_32 = arith.constant 0 : index
    %c56 = arith.constant 56 : index
    %38 = vector.load %arg12[%c0_32, %c56] : memref<8x768xf32, #tpu.memory_space<vmem>>, vector<8x512xf32>
    %c1_i32_33 = arith.constant 1 : i32
    %39 = vector.broadcast %c1_i32_33 : i32 to vector<1x512xi32>
    %40 = arith.cmpi sge, %21, %39 : vector<1x512xi32>
    %c1_i32_34 = arith.constant 1 : i32
    %41 = vector.broadcast %c1_i32_34 : i32 to vector<1x512xi32>
    %42 = arith.cmpi sge, %22, %41 : vector<1x512xi32>
    %43 = arith.andi %40, %42 : vector<1x512xi1>
    %cst_35 = arith.constant 0.000000e+00 : f32
    %44 = vector.shape_cast %43 : vector<1x512xi1> to vector<1x512xi1>
    %45 = vector.broadcast %44 : vector<1x512xi1> to vector<8x512xi1>
    %46 = vector.broadcast %cst_35 : f32 to vector<8x512xf32>
    %47 = arith.select %45, %38, %46 : vector<8x512xi1>, vector<8x512xf32>
    %c8 = arith.constant 8 : index
    %c0_36 = arith.constant 0 : index
    %48 = vector.load %arg13[%c8, %c0_36] : memref<216x512xf32, #tpu.memory_space<vmem>>, vector<8x512xf32>
    tpu.vector_store %arg13[%c8, %c0_36], %47 {strides = array<i32>} : memref<216x512xf32, #tpu.memory_space<vmem>>, vector<8x512xf32>,
    %c0_37 = arith.constant 0 : index
    %c57 = arith.constant 57 : index
    %49 = vector.load %arg12[%c0_37, %c57] : memref<8x768xf32, #tpu.memory_space<vmem>>, vector<8x512xf32>
    %c1_i32_38 = arith.constant 1 : i32
    %50 = vector.broadcast %c1_i32_38 : i32 to vector<1x512xi32>
    %51 = arith.cmpi sge, %21, %50 : vector<1x512xi32>
    %c1_i32_39 = arith.constant 1 : i32
    %52 = vector.broadcast %c1_i32_39 : i32 to vector<1x512xi32>
    %53 = arith.cmpi sge, %22, %52 : vector<1x512xi32>
    %c7_i32 = arith.constant 7 : i32
    %54 = vector.broadcast %c7_i32 : i32 to vector<1x512xi32>
    %55 = arith.cmpi slt, %23, %54 : vector<1x512xi32>
    %56 = arith.andi %51, %53 : vector<1x512xi1>
    %57 = arith.andi %56, %55 : vector<1x512xi1>
    %cst_40 = arith.constant 0.000000e+00 : f32
    %58 = vector.shape_cast %57 : vector<1x512xi1> to vector<1x512xi1>
    %59 = vector.broadcast %58 : vector<1x512xi1> to vector<8x512xi1>
    %60 = vector.broadcast %cst_40 : f32 to vector<8x512xf32>
    %61 = arith.select %59, %49, %60 : vector<8x512xi1>, vector<8x512xf32>
    %c16 = arith.constant 16 : index
    %c0_41 = arith.constant 0 : index
    %62 = vector.load %arg13[%c16, %c0_41] : memref<216x512xf32, #tpu.memory_space<vmem>>, vector<8x512xf32>
    tpu.vector_store %arg13[%c16, %c0_41], %61 {strides = array<i32>} : memref<216x512xf32, #tpu.memory_space<vmem>>, vector<8x512xf32>,
    %c0_42 = arith.constant 0 : index
    %c63 = arith.constant 63 : index
    %63 = vector.load %arg12[%c0_42, %c63] : memref<8x768xf32, #tpu.memory_space<vmem>>, vector<8x512xf32>
    %c1_i32_43 = arith.constant 1 : i32
    %64 = vector.broadcast %c1_i32_43 : i32 to vector<1x512xi32>
    %65 = arith.cmpi sge, %21, %64 : vector<1x512xi32>
    %c1_i32_44 = arith.constant 1 : i32
    %66 = vector.broadcast %c1_i32_44 : i32 to vector<1x512xi32>
    %67 = arith.cmpi sge, %23, %66 : vector<1x512xi32>
    %68 = arith.andi %65, %67 : vector<1x512xi1>
    %cst_45 = arith.constant 0.000000e+00 : f32
    %69 = vector.shape_cast %68 : vector<1x512xi1> to vector<1x512xi1>
    %70 = vector.broadcast %69 : vector<1x512xi1> to vector<8x512xi1>
    %71 = vector.broadcast %cst_45 : f32 to vector<8x512xf32>
    %72 = arith.select %70, %63, %71 : vector<8x512xi1>, vector<8x512xf32>
    %c24 = arith.constant 24 : index
    %c0_46 = arith.constant 0 : index
    %73 = vector.load %arg13[%c24, %c0_46] : memref<216x512xf32, #tpu.memory_space<vmem>>, vector<8x512xf32>
    tpu.vector_store %arg13[%c24, %c0_46], %72 {strides = array<i32>} : memref<216x512xf32, #tpu.memory_space<vmem>>, vector<8x512xf32>,
    %c0_47 = arith.constant 0 : index
    %c64 = arith.constant 64 : index
    %74 = vector.load %arg12[%c0_47, %c64] : memref<8x768xf32, #tpu.memory_space<vmem>>, vector<8x512xf32>
    %c1_i32_48 = arith.constant 1 : i32
    %75 = vector.broadcast %c1_i32_48 : i32 to vector<1x512xi32>
    %76 = arith.cmpi sge, %21, %75 : vector<1x512xi32>
    %cst_49 = arith.constant 0.000000e+00 : f32
    %77 = vector.shape_cast %76 : vector<1x512xi1> to vector<1x512xi1>
    %78 = vector.broadcast %77 : vector<1x512xi1> to vector<8x512xi1>
    %79 = vector.broadcast %cst_49 : f32 to vector<8x512xf32>
    %80 = arith.select %78, %74, %79 : vector<8x512xi1>, vector<8x512xf32>
    %c32 = arith.constant 32 : index
    %c0_50 = arith.constant 0 : index
    %81 = vector.load %arg13[%c32, %c0_50] : memref<216x512xf32, #tpu.memory_space<vmem>>, vector<8x512xf32>
    tpu.vector_store %arg13[%c32, %c0_50], %80 {strides = array<i32>} : memref<216x512xf32, #tpu.memory_space<vmem>>, vector<8x512xf32>,
    %c0_51 = arith.constant 0 : index
    %c65 = arith.constant 65 : index
    %82 = vector.load %arg12[%c0_51, %c65] : memref<8x768xf32, #tpu.memory_space<vmem>>, vector<8x512xf32>
    %c1_i32_52 = arith.constant 1 : i32
    %83 = vector.broadcast %c1_i32_52 : i32 to vector<1x512xi32>
    %84 = arith.cmpi sge, %21, %83 : vector<1x512xi32>
    %c7_i32_53 = arith.constant 7 : i32
    %85 = vector.broadcast %c7_i32_53 : i32 to vector<1x512xi32>
    %86 = arith.cmpi slt, %23, %85 : vector<1x512xi32>
    %87 = arith.andi %84, %86 : vector<1x512xi1>
    %cst_54 = arith.constant 0.000000e+00 : f32
    %88 = vector.shape_cast %87 : vector<1x512xi1> to vector<1x512xi1>
    %89 = vector.broadcast %88 : vector<1x512xi1> to vector<8x512xi1>
    %90 = vector.broadcast %cst_54 : f32 to vector<8x512xf32>
    %91 = arith.select %89, %82, %90 : vector<8x512xi1>, vector<8x512xf32>
    %c40 = arith.constant 40 : index
    %c0_55 = arith.constant 0 : index
    %92 = vector.load %arg13[%c40, %c0_55] : memref<216x512xf32, #tpu.memory_space<vmem>>, vector<8x512xf32>
    tpu.vector_store %arg13[%c40, %c0_55], %91 {strides = array<i32>} : memref<216x512xf32, #tpu.memory_space<vmem>>, vector<8x512xf32>,
    %c0_56 = arith.constant 0 : index
    %c71 = arith.constant 71 : index
    %93 = vector.load %arg12[%c0_56, %c71] : memref<8x768xf32, #tpu.memory_space<vmem>>, vector<8x512xf32>
    %c1_i32_57 = arith.constant 1 : i32
    %94 = vector.broadcast %c1_i32_57 : i32 to vector<1x512xi32>
    %95 = arith.cmpi sge, %21, %94 : vector<1x512xi32>
    %c7_i32_58 = arith.constant 7 : i32
    %96 = vector.broadcast %c7_i32_58 : i32 to vector<1x512xi32>
    %97 = arith.cmpi slt, %22, %96 : vector<1x512xi32>
    %c1_i32_59 = arith.constant 1 : i32
    %98 = vector.broadcast %c1_i32_59 : i32 to vector<1x512xi32>
    %99 = arith.cmpi sge, %23, %98 : vector<1x512xi32>
    %100 = arith.andi %95, %97 : vector<1x512xi1>
    %101 = arith.andi %100, %99 : vector<1x512xi1>
    %cst_60 = arith.constant 0.000000e+00 : f32
    %102 = vector.shape_cast %101 : vector<1x512xi1> to vector<1x512xi1>
    %103 = vector.broadcast %102 : vector<1x512xi1> to vector<8x512xi1>
    %104 = vector.broadcast %cst_60 : f32 to vector<8x512xf32>
    %105 = arith.select %103, %93, %104 : vector<8x512xi1>, vector<8x512xf32>
    %c48 = arith.constant 48 : index
    %c0_61 = arith.constant 0 : index
    %106 = vector.load %arg13[%c48, %c0_61] : memref<216x512xf32, #tpu.memory_space<vmem>>, vector<8x512xf32>
    tpu.vector_store %arg13[%c48, %c0_61], %105 {strides = array<i32>} : memref<216x512xf32, #tpu.memory_space<vmem>>, vector<8x512xf32>,
    %c0_62 = arith.constant 0 : index
    %c72 = arith.constant 72 : index
    %107 = vector.load %arg12[%c0_62, %c72] : memref<8x768xf32, #tpu.memory_space<vmem>>, vector<8x512xf32>
    %c1_i32_63 = arith.constant 1 : i32
    %108 = vector.broadcast %c1_i32_63 : i32 to vector<1x512xi32>
    %109 = arith.cmpi sge, %21, %108 : vector<1x512xi32>
    %c7_i32_64 = arith.constant 7 : i32
    %110 = vector.broadcast %c7_i32_64 : i32 to vector<1x512xi32>
    %111 = arith.cmpi slt, %22, %110 : vector<1x512xi32>
    %112 = arith.andi %109, %111 : vector<1x512xi1>
    %cst_65 = arith.constant 0.000000e+00 : f32
    %113 = vector.shape_cast %112 : vector<1x512xi1> to vector<1x512xi1>
    %114 = vector.broadcast %113 : vector<1x512xi1> to vector<8x512xi1>
    %115 = vector.broadcast %cst_65 : f32 to vector<8x512xf32>
    %116 = arith.select %114, %107, %115 : vector<8x512xi1>, vector<8x512xf32>
    %c56_66 = arith.constant 56 : index
    %c0_67 = arith.constant 0 : index
    %117 = vector.load %arg13[%c56_66, %c0_67] : memref<216x512xf32, #tpu.memory_space<vmem>>, vector<8x512xf32>
    tpu.vector_store %arg13[%c56_66, %c0_67], %116 {strides = array<i32>} : memref<216x512xf32, #tpu.memory_space<vmem>>, vector<8x512xf32>,
    %c0_68 = arith.constant 0 : index
    %c73 = arith.constant 73 : index
    %118 = vector.load %arg12[%c0_68, %c73] : memref<8x768xf32, #tpu.memory_space<vmem>>, vector<8x512xf32>
    %c1_i32_69 = arith.constant 1 : i32
    %119 = vector.broadcast %c1_i32_69 : i32 to vector<1x512xi32>
    %120 = arith.cmpi sge, %21, %119 : vector<1x512xi32>
    %c7_i32_70 = arith.constant 7 : i32
    %121 = vector.broadcast %c7_i32_70 : i32 to vector<1x512xi32>
    %122 = arith.cmpi slt, %22, %121 : vector<1x512xi32>
    %c7_i32_71 = arith.constant 7 : i32
    %123 = vector.broadcast %c7_i32_71 : i32 to vector<1x512xi32>
    %124 = arith.cmpi slt, %23, %123 : vector<1x512xi32>
    %125 = arith.andi %120, %122 : vector<1x512xi1>
    %126 = arith.andi %125, %124 : vector<1x512xi1>
    %cst_72 = arith.constant 0.000000e+00 : f32
    %127 = vector.shape_cast %126 : vector<1x512xi1> to vector<1x512xi1>
    %128 = vector.broadcast %127 : vector<1x512xi1> to vector<8x512xi1>
    %129 = vector.broadcast %cst_72 : f32 to vector<8x512xf32>
    %130 = arith.select %128, %118, %129 : vector<8x512xi1>, vector<8x512xf32>
    %c64_73 = arith.constant 64 : index
    %c0_74 = arith.constant 0 : index
    %131 = vector.load %arg13[%c64_73, %c0_74] : memref<216x512xf32, #tpu.memory_space<vmem>>, vector<8x512xf32>
    tpu.vector_store %arg13[%c64_73, %c0_74], %130 {strides = array<i32>} : memref<216x512xf32, #tpu.memory_space<vmem>>, vector<8x512xf32>,
    %c0_75 = arith.constant 0 : index
    %c119 = arith.constant 119 : index
    %132 = vector.load %arg12[%c0_75, %c119] : memref<8x768xf32, #tpu.memory_space<vmem>>, vector<8x512xf32>
    %c1_i32_76 = arith.constant 1 : i32
    %133 = vector.broadcast %c1_i32_76 : i32 to vector<1x512xi32>
    %134 = arith.cmpi sge, %22, %133 : vector<1x512xi32>
    %c1_i32_77 = arith.constant 1 : i32
    %135 = vector.broadcast %c1_i32_77 : i32 to vector<1x512xi32>
    %136 = arith.cmpi sge, %23, %135 : vector<1x512xi32>
    %137 = arith.andi %134, %136 : vector<1x512xi1>
    %cst_78 = arith.constant 0.000000e+00 : f32
    %138 = vector.shape_cast %137 : vector<1x512xi1> to vector<1x512xi1>
    %139 = vector.broadcast %138 : vector<1x512xi1> to vector<8x512xi1>
    %140 = vector.broadcast %cst_78 : f32 to vector<8x512xf32>
    %141 = arith.select %139, %132, %140 : vector<8x512xi1>, vector<8x512xf32>
    %c72_79 = arith.constant 72 : index
    %c0_80 = arith.constant 0 : index
    %142 = vector.load %arg13[%c72_79, %c0_80] : memref<216x512xf32, #tpu.memory_space<vmem>>, vector<8x512xf32>
    tpu.vector_store %arg13[%c72_79, %c0_80], %141 {strides = array<i32>} : memref<216x512xf32, #tpu.memory_space<vmem>>, vector<8x512xf32>,
    %c0_81 = arith.constant 0 : index
    %c120 = arith.constant 120 : index
    %143 = vector.load %arg12[%c0_81, %c120] : memref<8x768xf32, #tpu.memory_space<vmem>>, vector<8x512xf32>
    %c1_i32_82 = arith.constant 1 : i32
    %144 = vector.broadcast %c1_i32_82 : i32 to vector<1x512xi32>
    %145 = arith.cmpi sge, %22, %144 : vector<1x512xi32>
    %cst_83 = arith.constant 0.000000e+00 : f32
    %146 = vector.shape_cast %145 : vector<1x512xi1> to vector<1x512xi1>
    %147 = vector.broadcast %146 : vector<1x512xi1> to vector<8x512xi1>
    %148 = vector.broadcast %cst_83 : f32 to vector<8x512xf32>
    %149 = arith.select %147, %143, %148 : vector<8x512xi1>, vector<8x512xf32>
    %c80 = arith.constant 80 : index
    %c0_84 = arith.constant 0 : index
    %150 = vector.load %arg13[%c80, %c0_84] : memref<216x512xf32, #tpu.memory_space<vmem>>, vector<8x512xf32>
    tpu.vector_store %arg13[%c80, %c0_84], %149 {strides = array<i32>} : memref<216x512xf32, #tpu.memory_space<vmem>>, vector<8x512xf32>,
    %c0_85 = arith.constant 0 : index
    %c121 = arith.constant 121 : index
    %151 = vector.load %arg12[%c0_85, %c121] : memref<8x768xf32, #tpu.memory_space<vmem>>, vector<8x512xf32>
    %c1_i32_86 = arith.constant 1 : i32
    %152 = vector.broadcast %c1_i32_86 : i32 to vector<1x512xi32>
    %153 = arith.cmpi sge, %22, %152 : vector<1x512xi32>
    %c7_i32_87 = arith.constant 7 : i32
    %154 = vector.broadcast %c7_i32_87 : i32 to vector<1x512xi32>
    %155 = arith.cmpi slt, %23, %154 : vector<1x512xi32>
    %156 = arith.andi %153, %155 : vector<1x512xi1>
    %cst_88 = arith.constant 0.000000e+00 : f32
    %157 = vector.shape_cast %156 : vector<1x512xi1> to vector<1x512xi1>
    %158 = vector.broadcast %157 : vector<1x512xi1> to vector<8x512xi1>
    %159 = vector.broadcast %cst_88 : f32 to vector<8x512xf32>
    %160 = arith.select %158, %151, %159 : vector<8x512xi1>, vector<8x512xf32>
    %c88 = arith.constant 88 : index
    %c0_89 = arith.constant 0 : index
    %161 = vector.load %arg13[%c88, %c0_89] : memref<216x512xf32, #tpu.memory_space<vmem>>, vector<8x512xf32>
    tpu.vector_store %arg13[%c88, %c0_89], %160 {strides = array<i32>} : memref<216x512xf32, #tpu.memory_space<vmem>>, vector<8x512xf32>,
    %c0_90 = arith.constant 0 : index
    %c127 = arith.constant 127 : index
    %162 = vector.load %arg12[%c0_90, %c127] : memref<8x768xf32, #tpu.memory_space<vmem>>, vector<8x512xf32>
    %c1_i32_91 = arith.constant 1 : i32
    %163 = vector.broadcast %c1_i32_91 : i32 to vector<1x512xi32>
    %164 = arith.cmpi sge, %23, %163 : vector<1x512xi32>
    %cst_92 = arith.constant 0.000000e+00 : f32
    %165 = vector.shape_cast %164 : vector<1x512xi1> to vector<1x512xi1>
    %166 = vector.broadcast %165 : vector<1x512xi1> to vector<8x512xi1>
    %167 = vector.broadcast %cst_92 : f32 to vector<8x512xf32>
    %168 = arith.select %166, %162, %167 : vector<8x512xi1>, vector<8x512xf32>
    %c96 = arith.constant 96 : index
    %c0_93 = arith.constant 0 : index
    %169 = vector.load %arg13[%c96, %c0_93] : memref<216x512xf32, #tpu.memory_space<vmem>>, vector<8x512xf32>
    tpu.vector_store %arg13[%c96, %c0_93], %168 {strides = array<i32>} : memref<216x512xf32, #tpu.memory_space<vmem>>, vector<8x512xf32>,
    %c0_94 = arith.constant 0 : index
    %c128_95 = arith.constant 128 : index
    %170 = vector.load %arg12[%c0_94, %c128_95] : memref<8x768xf32, #tpu.memory_space<vmem>>, vector<8x512xf32>
    %c104 = arith.constant 104 : index
    %c0_96 = arith.constant 0 : index
    %171 = vector.load %arg13[%c104, %c0_96] : memref<216x512xf32, #tpu.memory_space<vmem>>, vector<8x512xf32>
    tpu.vector_store %arg13[%c104, %c0_96], %170 {strides = array<i32>} : memref<216x512xf32, #tpu.memory_space<vmem>>, vector<8x512xf32>,
    %c0_97 = arith.constant 0 : index
    %c129 = arith.constant 129 : index
    %172 = vector.load %arg12[%c0_97, %c129] : memref<8x768xf32, #tpu.memory_space<vmem>>, vector<8x512xf32>
    %c7_i32_98 = arith.constant 7 : i32
    %173 = vector.broadcast %c7_i32_98 : i32 to vector<1x512xi32>
    %174 = arith.cmpi slt, %23, %173 : vector<1x512xi32>
    %cst_99 = arith.constant 0.000000e+00 : f32
    %175 = vector.shape_cast %174 : vector<1x512xi1> to vector<1x512xi1>
    %176 = vector.broadcast %175 : vector<1x512xi1> to vector<8x512xi1>
    %177 = vector.broadcast %cst_99 : f32 to vector<8x512xf32>
    %178 = arith.select %176, %172, %177 : vector<8x512xi1>, vector<8x512xf32>
    %c112 = arith.constant 112 : index
    %c0_100 = arith.constant 0 : index
    %179 = vector.load %arg13[%c112, %c0_100] : memref<216x512xf32, #tpu.memory_space<vmem>>, vector<8x512xf32>
    tpu.vector_store %arg13[%c112, %c0_100], %178 {strides = array<i32>} : memref<216x512xf32, #tpu.memory_space<vmem>>, vector<8x512xf32>,
    %c0_101 = arith.constant 0 : index
    %c135 = arith.constant 135 : index
    %180 = vector.load %arg12[%c0_101, %c135] : memref<8x768xf32, #tpu.memory_space<vmem>>, vector<8x512xf32>
    %c7_i32_102 = arith.constant 7 : i32
    %181 = vector.broadcast %c7_i32_102 : i32 to vector<1x512xi32>
    %182 = arith.cmpi slt, %22, %181 : vector<1x512xi32>
    %c1_i32_103 = arith.constant 1 : i32
    %183 = vector.broadcast %c1_i32_103 : i32 to vector<1x512xi32>
    %184 = arith.cmpi sge, %23, %183 : vector<1x512xi32>
    %185 = arith.andi %182, %184 : vector<1x512xi1>
    %cst_104 = arith.constant 0.000000e+00 : f32
    %186 = vector.shape_cast %185 : vector<1x512xi1> to vector<1x512xi1>
    %187 = vector.broadcast %186 : vector<1x512xi1> to vector<8x512xi1>
    %188 = vector.broadcast %cst_104 : f32 to vector<8x512xf32>
    %189 = arith.select %187, %180, %188 : vector<8x512xi1>, vector<8x512xf32>
    %c120_105 = arith.constant 120 : index
    %c0_106 = arith.constant 0 : index
    %190 = vector.load %arg13[%c120_105, %c0_106] : memref<216x512xf32, #tpu.memory_space<vmem>>, vector<8x512xf32>
    tpu.vector_store %arg13[%c120_105, %c0_106], %189 {strides = array<i32>} : memref<216x512xf32, #tpu.memory_space<vmem>>, vector<8x512xf32>,
    %c0_107 = arith.constant 0 : index
    %c136 = arith.constant 136 : index
    %191 = vector.load %arg12[%c0_107, %c136] : memref<8x768xf32, #tpu.memory_space<vmem>>, vector<8x512xf32>
    %c7_i32_108 = arith.constant 7 : i32
    %192 = vector.broadcast %c7_i32_108 : i32 to vector<1x512xi32>
    %193 = arith.cmpi slt, %22, %192 : vector<1x512xi32>
    %cst_109 = arith.constant 0.000000e+00 : f32
    %194 = vector.shape_cast %193 : vector<1x512xi1> to vector<1x512xi1>
    %195 = vector.broadcast %194 : vector<1x512xi1> to vector<8x512xi1>
    %196 = vector.broadcast %cst_109 : f32 to vector<8x512xf32>
    %197 = arith.select %195, %191, %196 : vector<8x512xi1>, vector<8x512xf32>
    %c128_110 = arith.constant 128 : index
    %c0_111 = arith.constant 0 : index
    %198 = vector.load %arg13[%c128_110, %c0_111] : memref<216x512xf32, #tpu.memory_space<vmem>>, vector<8x512xf32>
    tpu.vector_store %arg13[%c128_110, %c0_111], %197 {strides = array<i32>} : memref<216x512xf32, #tpu.memory_space<vmem>>, vector<8x512xf32>,
    %c0_112 = arith.constant 0 : index
    %c137 = arith.constant 137 : index
    %199 = vector.load %arg12[%c0_112, %c137] : memref<8x768xf32, #tpu.memory_space<vmem>>, vector<8x512xf32>
    %c7_i32_113 = arith.constant 7 : i32
    %200 = vector.broadcast %c7_i32_113 : i32 to vector<1x512xi32>
    %201 = arith.cmpi slt, %22, %200 : vector<1x512xi32>
    %c7_i32_114 = arith.constant 7 : i32
    %202 = vector.broadcast %c7_i32_114 : i32 to vector<1x512xi32>
    %203 = arith.cmpi slt, %23, %202 : vector<1x512xi32>
    %204 = arith.andi %201, %203 : vector<1x512xi1>
    %cst_115 = arith.constant 0.000000e+00 : f32
    %205 = vector.shape_cast %204 : vector<1x512xi1> to vector<1x512xi1>
    %206 = vector.broadcast %205 : vector<1x512xi1> to vector<8x512xi1>
    %207 = vector.broadcast %cst_115 : f32 to vector<8x512xf32>
    %208 = arith.select %206, %199, %207 : vector<8x512xi1>, vector<8x512xf32>
    %c136_116 = arith.constant 136 : index
    %c0_117 = arith.constant 0 : index
    %209 = vector.load %arg13[%c136_116, %c0_117] : memref<216x512xf32, #tpu.memory_space<vmem>>, vector<8x512xf32>
    tpu.vector_store %arg13[%c136_116, %c0_117], %208 {strides = array<i32>} : memref<216x512xf32, #tpu.memory_space<vmem>>, vector<8x512xf32>,
    %c0_118 = arith.constant 0 : index
    %c183 = arith.constant 183 : index
    %210 = vector.load %arg12[%c0_118, %c183] : memref<8x768xf32, #tpu.memory_space<vmem>>, vector<8x512xf32>
    %c7_i32_119 = arith.constant 7 : i32
    %211 = vector.broadcast %c7_i32_119 : i32 to vector<1x512xi32>
    %212 = arith.cmpi slt, %21, %211 : vector<1x512xi32>
    %c1_i32_120 = arith.constant 1 : i32
    %213 = vector.broadcast %c1_i32_120 : i32 to vector<1x512xi32>
    %214 = arith.cmpi sge, %22, %213 : vector<1x512xi32>
    %c1_i32_121 = arith.constant 1 : i32
    %215 = vector.broadcast %c1_i32_121 : i32 to vector<1x512xi32>
    %216 = arith.cmpi sge, %23, %215 : vector<1x512xi32>
    %217 = arith.andi %212, %214 : vector<1x512xi1>
    %218 = arith.andi %217, %216 : vector<1x512xi1>
    %cst_122 = arith.constant 0.000000e+00 : f32
    %219 = vector.shape_cast %218 : vector<1x512xi1> to vector<1x512xi1>
    %220 = vector.broadcast %219 : vector<1x512xi1> to vector<8x512xi1>
    %221 = vector.broadcast %cst_122 : f32 to vector<8x512xf32>
    %222 = arith.select %220, %210, %221 : vector<8x512xi1>, vector<8x512xf32>
    %c144 = arith.constant 144 : index
    %c0_123 = arith.constant 0 : index
    %223 = vector.load %arg13[%c144, %c0_123] : memref<216x512xf32, #tpu.memory_space<vmem>>, vector<8x512xf32>
    tpu.vector_store %arg13[%c144, %c0_123], %222 {strides = array<i32>} : memref<216x512xf32, #tpu.memory_space<vmem>>, vector<8x512xf32>,
    %c0_124 = arith.constant 0 : index
    %c184 = arith.constant 184 : index
    %224 = vector.load %arg12[%c0_124, %c184] : memref<8x768xf32, #tpu.memory_space<vmem>>, vector<8x512xf32>
    %c7_i32_125 = arith.constant 7 : i32
    %225 = vector.broadcast %c7_i32_125 : i32 to vector<1x512xi32>
    %226 = arith.cmpi slt, %21, %225 : vector<1x512xi32>
    %c1_i32_126 = arith.constant 1 : i32
    %227 = vector.broadcast %c1_i32_126 : i32 to vector<1x512xi32>
    %228 = arith.cmpi sge, %22, %227 : vector<1x512xi32>
    %229 = arith.andi %226, %228 : vector<1x512xi1>
    %cst_127 = arith.constant 0.000000e+00 : f32
    %230 = vector.shape_cast %229 : vector<1x512xi1> to vector<1x512xi1>
    %231 = vector.broadcast %230 : vector<1x512xi1> to vector<8x512xi1>
    %232 = vector.broadcast %cst_127 : f32 to vector<8x512xf32>
    %233 = arith.select %231, %224, %232 : vector<8x512xi1>, vector<8x512xf32>
    %c152 = arith.constant 152 : index
    %c0_128 = arith.constant 0 : index
    %234 = vector.load %arg13[%c152, %c0_128] : memref<216x512xf32, #tpu.memory_space<vmem>>, vector<8x512xf32>
    tpu.vector_store %arg13[%c152, %c0_128], %233 {strides = array<i32>} : memref<216x512xf32, #tpu.memory_space<vmem>>, vector<8x512xf32>,
    %c0_129 = arith.constant 0 : index
    %c185 = arith.constant 185 : index
    %235 = vector.load %arg12[%c0_129, %c185] : memref<8x768xf32, #tpu.memory_space<vmem>>, vector<8x512xf32>
    %c7_i32_130 = arith.constant 7 : i32
    %236 = vector.broadcast %c7_i32_130 : i32 to vector<1x512xi32>
    %237 = arith.cmpi slt, %21, %236 : vector<1x512xi32>
    %c1_i32_131 = arith.constant 1 : i32
    %238 = vector.broadcast %c1_i32_131 : i32 to vector<1x512xi32>
    %239 = arith.cmpi sge, %22, %238 : vector<1x512xi32>
    %c7_i32_132 = arith.constant 7 : i32
    %240 = vector.broadcast %c7_i32_132 : i32 to vector<1x512xi32>
    %241 = arith.cmpi slt, %23, %240 : vector<1x512xi32>
    %242 = arith.andi %237, %239 : vector<1x512xi1>
    %243 = arith.andi %242, %241 : vector<1x512xi1>
    %cst_133 = arith.constant 0.000000e+00 : f32
    %244 = vector.shape_cast %243 : vector<1x512xi1> to vector<1x512xi1>
    %245 = vector.broadcast %244 : vector<1x512xi1> to vector<8x512xi1>
    %246 = vector.broadcast %cst_133 : f32 to vector<8x512xf32>
    %247 = arith.select %245, %235, %246 : vector<8x512xi1>, vector<8x512xf32>
    %c160 = arith.constant 160 : index
    %c0_134 = arith.constant 0 : index
    %248 = vector.load %arg13[%c160, %c0_134] : memref<216x512xf32, #tpu.memory_space<vmem>>, vector<8x512xf32>
    tpu.vector_store %arg13[%c160, %c0_134], %247 {strides = array<i32>} : memref<216x512xf32, #tpu.memory_space<vmem>>, vector<8x512xf32>,
    %c0_135 = arith.constant 0 : index
    %c191 = arith.constant 191 : index
    %249 = vector.load %arg12[%c0_135, %c191] : memref<8x768xf32, #tpu.memory_space<vmem>>, vector<8x512xf32>
    %c7_i32_136 = arith.constant 7 : i32
    %250 = vector.broadcast %c7_i32_136 : i32 to vector<1x512xi32>
    %251 = arith.cmpi slt, %21, %250 : vector<1x512xi32>
    %c1_i32_137 = arith.constant 1 : i32
    %252 = vector.broadcast %c1_i32_137 : i32 to vector<1x512xi32>
    %253 = arith.cmpi sge, %23, %252 : vector<1x512xi32>
    %254 = arith.andi %251, %253 : vector<1x512xi1>
    %cst_138 = arith.constant 0.000000e+00 : f32
    %255 = vector.shape_cast %254 : vector<1x512xi1> to vector<1x512xi1>
    %256 = vector.broadcast %255 : vector<1x512xi1> to vector<8x512xi1>
    %257 = vector.broadcast %cst_138 : f32 to vector<8x512xf32>
    %258 = arith.select %256, %249, %257 : vector<8x512xi1>, vector<8x512xf32>
    %c168 = arith.constant 168 : index
    %c0_139 = arith.constant 0 : index
    %259 = vector.load %arg13[%c168, %c0_139] : memref<216x512xf32, #tpu.memory_space<vmem>>, vector<8x512xf32>
    tpu.vector_store %arg13[%c168, %c0_139], %258 {strides = array<i32>} : memref<216x512xf32, #tpu.memory_space<vmem>>, vector<8x512xf32>,
    %c0_140 = arith.constant 0 : index
    %c192 = arith.constant 192 : index
    %260 = vector.load %arg12[%c0_140, %c192] : memref<8x768xf32, #tpu.memory_space<vmem>>, vector<8x512xf32>
    %c7_i32_141 = arith.constant 7 : i32
    %261 = vector.broadcast %c7_i32_141 : i32 to vector<1x512xi32>
    %262 = arith.cmpi slt, %21, %261 : vector<1x512xi32>
    %cst_142 = arith.constant 0.000000e+00 : f32
    %263 = vector.shape_cast %262 : vector<1x512xi1> to vector<1x512xi1>
    %264 = vector.broadcast %263 : vector<1x512xi1> to vector<8x512xi1>
    %265 = vector.broadcast %cst_142 : f32 to vector<8x512xf32>
    %266 = arith.select %264, %260, %265 : vector<8x512xi1>, vector<8x512xf32>
    %c176 = arith.constant 176 : index
    %c0_143 = arith.constant 0 : index
    %267 = vector.load %arg13[%c176, %c0_143] : memref<216x512xf32, #tpu.memory_space<vmem>>, vector<8x512xf32>
    tpu.vector_store %arg13[%c176, %c0_143], %266 {strides = array<i32>} : memref<216x512xf32, #tpu.memory_space<vmem>>, vector<8x512xf32>,
    %c0_144 = arith.constant 0 : index
    %c193 = arith.constant 193 : index
    %268 = vector.load %arg12[%c0_144, %c193] : memref<8x768xf32, #tpu.memory_space<vmem>>, vector<8x512xf32>
    %c7_i32_145 = arith.constant 7 : i32
    %269 = vector.broadcast %c7_i32_145 : i32 to vector<1x512xi32>
    %270 = arith.cmpi slt, %21, %269 : vector<1x512xi32>
    %c7_i32_146 = arith.constant 7 : i32
    %271 = vector.broadcast %c7_i32_146 : i32 to vector<1x512xi32>
    %272 = arith.cmpi slt, %23, %271 : vector<1x512xi32>
    %273 = arith.andi %270, %272 : vector<1x512xi1>
    %cst_147 = arith.constant 0.000000e+00 : f32
    %274 = vector.shape_cast %273 : vector<1x512xi1> to vector<1x512xi1>
    %275 = vector.broadcast %274 : vector<1x512xi1> to vector<8x512xi1>
    %276 = vector.broadcast %cst_147 : f32 to vector<8x512xf32>
    %277 = arith.select %275, %268, %276 : vector<8x512xi1>, vector<8x512xf32>
    %c184_148 = arith.constant 184 : index
    %c0_149 = arith.constant 0 : index
    %278 = vector.load %arg13[%c184_148, %c0_149] : memref<216x512xf32, #tpu.memory_space<vmem>>, vector<8x512xf32>
    tpu.vector_store %arg13[%c184_148, %c0_149], %277 {strides = array<i32>} : memref<216x512xf32, #tpu.memory_space<vmem>>, vector<8x512xf32>,
    %c0_150 = arith.constant 0 : index
    %c199 = arith.constant 199 : index
    %279 = vector.load %arg12[%c0_150, %c199] : memref<8x768xf32, #tpu.memory_space<vmem>>, vector<8x512xf32>
    %c7_i32_151 = arith.constant 7 : i32
    %280 = vector.broadcast %c7_i32_151 : i32 to vector<1x512xi32>
    %281 = arith.cmpi slt, %21, %280 : vector<1x512xi32>
    %c7_i32_152 = arith.constant 7 : i32
    %282 = vector.broadcast %c7_i32_152 : i32 to vector<1x512xi32>
    %283 = arith.cmpi slt, %22, %282 : vector<1x512xi32>
    %c1_i32_153 = arith.constant 1 : i32
    %284 = vector.broadcast %c1_i32_153 : i32 to vector<1x512xi32>
    %285 = arith.cmpi sge, %23, %284 : vector<1x512xi32>
    %286 = arith.andi %281, %283 : vector<1x512xi1>
    %287 = arith.andi %286, %285 : vector<1x512xi1>
    %cst_154 = arith.constant 0.000000e+00 : f32
    %288 = vector.shape_cast %287 : vector<1x512xi1> to vector<1x512xi1>
    %289 = vector.broadcast %288 : vector<1x512xi1> to vector<8x512xi1>
    %290 = vector.broadcast %cst_154 : f32 to vector<8x512xf32>
    %291 = arith.select %289, %279, %290 : vector<8x512xi1>, vector<8x512xf32>
    %c192_155 = arith.constant 192 : index
    %c0_156 = arith.constant 0 : index
    %292 = vector.load %arg13[%c192_155, %c0_156] : memref<216x512xf32, #tpu.memory_space<vmem>>, vector<8x512xf32>
    tpu.vector_store %arg13[%c192_155, %c0_156], %291 {strides = array<i32>} : memref<216x512xf32, #tpu.memory_space<vmem>>, vector<8x512xf32>,
    %c0_157 = arith.constant 0 : index
    %c200 = arith.constant 200 : index
    %293 = vector.load %arg12[%c0_157, %c200] : memref<8x768xf32, #tpu.memory_space<vmem>>, vector<8x512xf32>
    %c7_i32_158 = arith.constant 7 : i32
    %294 = vector.broadcast %c7_i32_158 : i32 to vector<1x512xi32>
    %295 = arith.cmpi slt, %21, %294 : vector<1x512xi32>
    %c7_i32_159 = arith.constant 7 : i32
    %296 = vector.broadcast %c7_i32_159 : i32 to vector<1x512xi32>
    %297 = arith.cmpi slt, %22, %296 : vector<1x512xi32>
    %298 = arith.andi %295, %297 : vector<1x512xi1>
    %cst_160 = arith.constant 0.000000e+00 : f32
    %299 = vector.shape_cast %298 : vector<1x512xi1> to vector<1x512xi1>
    %300 = vector.broadcast %299 : vector<1x512xi1> to vector<8x512xi1>
    %301 = vector.broadcast %cst_160 : f32 to vector<8x512xf32>
    %302 = arith.select %300, %293, %301 : vector<8x512xi1>, vector<8x512xf32>
    %c200_161 = arith.constant 200 : index
    %c0_162 = arith.constant 0 : index
    %303 = vector.load %arg13[%c200_161, %c0_162] : memref<216x512xf32, #tpu.memory_space<vmem>>, vector<8x512xf32>
    tpu.vector_store %arg13[%c200_161, %c0_162], %302 {strides = array<i32>} : memref<216x512xf32, #tpu.memory_space<vmem>>, vector<8x512xf32>,
    %c0_163 = arith.constant 0 : index
    %c201 = arith.constant 201 : index
    %304 = vector.load %arg12[%c0_163, %c201] : memref<8x768xf32, #tpu.memory_space<vmem>>, vector<8x512xf32>
    %c7_i32_164 = arith.constant 7 : i32
    %305 = vector.broadcast %c7_i32_164 : i32 to vector<1x512xi32>
    %306 = arith.cmpi slt, %21, %305 : vector<1x512xi32>
    %c7_i32_165 = arith.constant 7 : i32
    %307 = vector.broadcast %c7_i32_165 : i32 to vector<1x512xi32>
    %308 = arith.cmpi slt, %22, %307 : vector<1x512xi32>
    %c7_i32_166 = arith.constant 7 : i32
    %309 = vector.broadcast %c7_i32_166 : i32 to vector<1x512xi32>
    %310 = arith.cmpi slt, %23, %309 : vector<1x512xi32>
    %311 = arith.andi %306, %308 : vector<1x512xi1>
    %312 = arith.andi %311, %310 : vector<1x512xi1>
    %cst_167 = arith.constant 0.000000e+00 : f32
    %313 = vector.shape_cast %312 : vector<1x512xi1> to vector<1x512xi1>
    %314 = vector.broadcast %313 : vector<1x512xi1> to vector<8x512xi1>
    %315 = vector.broadcast %cst_167 : f32 to vector<8x512xf32>
    %316 = arith.select %314, %304, %315 : vector<8x512xi1>, vector<8x512xf32>
    %c208 = arith.constant 208 : index
    %c0_168 = arith.constant 0 : index
    %317 = vector.load %arg13[%c208, %c0_168] : memref<216x512xf32, #tpu.memory_space<vmem>>, vector<8x512xf32>
    tpu.vector_store %arg13[%c208, %c0_168], %316 {strides = array<i32>} : memref<216x512xf32, #tpu.memory_space<vmem>>, vector<8x512xf32>,
    %c0_169 = arith.constant 0 : index
    %c0_170 = arith.constant 0 : index
    %318 = vector.load %arg7[%c0_169, %c0_170] : memref<8x216xf32, #tpu.memory_space<vmem>>, vector<8x216xf32>
    %c0_171 = arith.constant 0 : index
    %c0_172 = arith.constant 0 : index
    %319 = vector.load %arg13[%c0_171, %c0_172] : memref<216x512xf32, #tpu.memory_space<vmem>>, vector<216x512xf32>
    %cst_173 = arith.constant dense<0.000000e+00> : vector<8x512xf32>
    %320 = tpu.matmul %318, %319, %cst_173 {dimension_numbers = #tpu.dot_dimension_numbers<[1], [0], [0], [1], [0, 0, 1, 1], [], []>} : vector<8x216xf32>, vector<216x512xf32>, vector<8x512xf32> -> vector<8x512xf32>
    %c0_174 = arith.constant 0 : index
    %c0_175 = arith.constant 0 : index
    %321 = vector.load %arg8[%c0_174, %c0_175] : memref<8x1xf32, #tpu.memory_space<vmem>>, vector<8x1xf32>
    %322 = vector.broadcast %321 : vector<8x1xf32> to vector<8x512xf32>
    %323 = arith.addf %320, %322 : vector<8x512xf32>
    %c0_176 = arith.constant 0 : index
    %c0_177 = arith.constant 0 : index
    %324 = vector.load %arg9[%c0_176, %c0_177] : memref<4x8xf32, #tpu.memory_space<vmem>>, vector<4x8xf32>
    %cst_178 = arith.constant dense<0.000000e+00> : vector<4x512xf32>
    %325 = tpu.matmul %324, %323, %cst_178 {dimension_numbers = #tpu.dot_dimension_numbers<[1], [0], [0], [1], [0, 0, 1, 1], [], []>} : vector<4x8xf32>, vector<8x512xf32>, vector<4x512xf32> -> vector<4x512xf32>
    %c0_179 = arith.constant 0 : index
    %c0_180 = arith.constant 0 : index
    %326 = vector.load %arg10[%c0_179, %c0_180] : memref<4x1xf32, #tpu.memory_space<vmem>>, vector<4x1xf32>
    %327 = vector.broadcast %326 : vector<4x1xf32> to vector<4x512xf32>
    %328 = arith.addf %325, %327 : vector<4x512xf32>
    %329 = arith.addf %328, %0 : vector<4x512xf32>
    %c0_181 = arith.constant 0 : index
    %c0_182 = arith.constant 0 : index
    %330 = vector.load %arg11[%c0_181, %c0_182] : memref<4x512xf32, #tpu.memory_space<vmem>>, vector<4x512xf32>
    tpu.vector_store %arg11[%c0_181, %c0_182], %329 {strides = array<i32>} : memref<4x512xf32, #tpu.memory_space<vmem>>, vector<4x512xf32>,
    return
  }
  func.func @transform_0(%arg0: i32) -> (i32, i32) {
    %c0_i32 = arith.constant 0 : i32
    %c0_i32_0 = arith.constant 0 : i32
    return %c0_i32, %arg0 : i32, i32
  }
  func.func @transform_1(%arg0: i32) -> (i32, i32) {
    %c1_i32 = arith.constant 1 : i32
    %0 = arith.addi %arg0, %c1_i32 : i32
    %c0_i32 = arith.constant 0 : i32
    %c0_i32_0 = arith.constant 0 : i32
    return %c0_i32, %0 : i32, i32
  }
  func.func @transform_2(%arg0: i32) -> (i32, i32) {
    %c2_i32 = arith.constant 2 : i32
    %0 = arith.addi %arg0, %c2_i32 : i32
    %c0_i32 = arith.constant 0 : i32
    %c0_i32_0 = arith.constant 0 : i32
    return %c0_i32, %0 : i32, i32
  }
  func.func @transform_3(%arg0: i32) -> (i32, i32) {
    %c0_i32 = arith.constant 0 : i32
    %c0_i32_0 = arith.constant 0 : i32
    return %c0_i32, %arg0 : i32, i32
  }
  func.func @transform_4(%arg0: i32) -> (i32, i32) {
    %c0_i32 = arith.constant 0 : i32
    %c0_i32_0 = arith.constant 0 : i32
    %c0_i32_1 = arith.constant 0 : i32
    return %c0_i32, %c0_i32_0 : i32, i32
  }
  func.func @transform_5(%arg0: i32) -> (i32, i32) {
    %c0_i32 = arith.constant 0 : i32
    %c0_i32_0 = arith.constant 0 : i32
    %c0_i32_1 = arith.constant 0 : i32
    return %c0_i32, %c0_i32_0 : i32, i32
  }
  func.func @transform_6(%arg0: i32) -> (i32, i32) {
    %c0_i32 = arith.constant 0 : i32
    %c0_i32_0 = arith.constant 0 : i32
    %c0_i32_1 = arith.constant 0 : i32
    return %c0_i32, %c0_i32_0 : i32, i32
  }
  func.func @transform_7(%arg0: i32) -> (i32, i32) {
    %c0_i32 = arith.constant 0 : i32
    %c0_i32_0 = arith.constant 0 : i32
    %c0_i32_1 = arith.constant 0 : i32
    return %c0_i32, %c0_i32_0 : i32, i32
  }
  func.func @transform_8(%arg0: i32) -> (i32, i32) {
    %c0_i32 = arith.constant 0 : i32
    %c0_i32_0 = arith.constant 0 : i32
    %c0_i32_1 = arith.constant 0 : i32
    return %c0_i32, %c0_i32_0 : i32, i32
  }
  func.func @transform_9(%arg0: i32) -> (i32, i32) {
    %c0_i32 = arith.constant 0 : i32
    %c0_i32_0 = arith.constant 0 : i32
    %c0_i32_1 = arith.constant 0 : i32
    return %c0_i32, %c0_i32_0 : i32, i32
  }
  func.func @transform_10(%arg0: i32) -> (i32, i32) {
    %c0_i32 = arith.constant 0 : i32
    %c0_i32_0 = arith.constant 0 : i32
    return %c0_i32, %arg0 : i32, i32
  }
}

</mosaic_0001>

<bundles_post_ra>
// kernel: tpu_custom_call.1
= control target key start
LH: loop header
LB: loop body
LE: loop exit
PB: predicated region body
PF: predicated region fallthrough
CT: control target
= control target key end

     0   :  { %s4433_s0 = inlined_call_operand.hbm [shape: f32[4,2048], index: 0, kind: input, shape index: {}]   ;;  %s4434_s1 = inlined_call_operand.hbm [shape: f32[4,2048], index: 1, kind: input, shape index: {}]   ;;  %s4435_s2 = inlined_call_operand.hbm [shape: f32[4,2048], index: 2, kind: input, shape index: {}]   ;;  %s4436_s3 = inlined_call_operand.hbm [shape: s32[8,1024], index: 3, kind: input, shape index: {}]   ;;  %s4437_s4 = inlined_call_operand.vmem [shape: f32[8,4], index: 4, kind: input, shape index: {}]   ;;  %s4438_s5 = inlined_call_operand.vmem [shape: f32[8,1], index: 5, kind: input, shape index: {}]   ;;  %s4439_s6 = inlined_call_operand.vmem [shape: f32[8,216], index: 6, kind: input, shape index: {}]   ;;  %s4440_s7 = inlined_call_operand.vmem [shape: f32[8,1], index: 7, kind: input, shape index: {}]   ;;  %s4441_s8 = inlined_call_operand.vmem [shape: f32[4,8], index: 8, kind: input, shape index: {}]   ;;  %s4442_s9 = inlined_call_operand.vmem [shape: f32[4,1], index: 9, kind: input, shape index: {}]   ;;  %s4443_s10 = inlined_call_operand.hbm [shape: f32[4,1024], index: 10, kind: output, shape index: {}]  }
   0x1   :  { %4486 = sst [smem:[#allocation49_spill]] %s4433_s0 }
   0x2   :  { %4487 = sst [smem:[#allocation50_spill]] %s4434_s1 }
   0x3   :  { %4488 = sst [smem:[#allocation51_spill]] %s4439_s6 }
   0x4   :  { %4489 = sst [smem:[#allocation52_spill]] %s4440_s7 }
   0x5   :  { %4490 = sst [smem:[#allocation53_spill]] %s4441_s8 }
   0x6   :  { %4491 = sst [smem:[#allocation54_spill]] %s4442_s9 }
   0x7   :  { %4492 = sst [smem:[#allocation55_spill]] %s4443_s10 }
   0x8   :  { %15 = vsyncpa [#allocation5], 0 }
   0x9   :  { %17 = vsyncpa [#allocation5 + $0x1], 0 }
   0xa   :  { %18 = vsyncpa [#allocation8], 0 }
   0xb   :  { %20 = vsyncpa [#allocation8 + $0x1], 0 }
   0xc   :  { %21 = vsyncpa [#allocation11], 0 }
   0xd   :  { %23 = vsyncpa [#allocation11 + $0x1], 0 }
   0xe   :  { %24 = vsyncpa [#allocation6], 0 }
   0xf   :  { %26 = vsyncpa [#allocation6 + $0x1], 0  ;;  %s3054_s13 = smov 0   ;;  %s3056_s14 = smov 0  }
  0x10   :  { %s3058_s15 = smov 0   ;;  %s3060_s16 = smov 0  }
  0x11   :  { %s3062_s17 = smov 0   ;;  %s3064_s18 = smov 0  }
  0x12   :  { %s3066_s19 = smov 0   ;;  %s3068_s20 = smov 0  }
  0x13   :  { %s3070_s21 = smov 0   ;;  %s3072_s22 = smov 0  }
  0x14 LB: > { %4493 = sst [smem:[#allocation18_spill]] %s2951_s15  ;;  %s3103_s23 = sadd.s32 4294967295, %s2979_s22   ;;  %s2979_s22 = sphi %s3072_s22, %s4623_s22   ;;  %s2975_s21 = sphi %s3070_s21, %s4636_s21   ;;  %s2971_s20 = sphi %s3068_s20, %s4635_s20   ;;  %s2967_s19 = sphi %s3066_s19, %s4634_s19   ;;  %s2963_s18 = sphi %s3064_s18, %s4627_s18   ;;  %s2959_s17 = sphi %s3062_s17, %s4633_s17   ;;  %s2955_s16 = sphi %s3060_s16, %s4632_s16   ;;  %s2951_s15 = sphi %s3058_s15, %s4625_s15   ;;  %s2947_s14 = sphi %s3056_s14, %s4631_s14   ;;  %s2943_s13 = sphi %s3054_s13, %s4630_s13  }
  0x15   : > { %4494 = sst [smem:[#allocation19_spill]] %s2963_s18  ;;  %s3106_s24 = sadd.s32 1, %s2979_s22  }
  0x16   : > { %4495 = sst [smem:[#allocation20_spill]] %s2967_s19  ;;  %p4452_p0 = scmp.eq.s32.totalorder %s2979_s22, 0 }
  0x17   : > { %4496 = sst [smem:[#allocation21_spill]] %s2975_s21  ;;  %p4451_p1 = scmp.eq.s32.totalorder %s3103_s23, 0 }
  0x18   : > { %4497 = sst [smem:[#allocation22_spill]] %s2979_s22  ;;  %s63_s25 = sadd.s32 1, %s3106_s24 }
  0x19   : > { %4498 = sst [smem:[#allocation23_spill]] %s3106_s24  ;;  %s67_s26 = sadd.s32 1, %s2963_s18 }
  0x1a   : > { %s64_s27 = ssub.s32 %s3106_s24, %s63_s25  ;;  %p74_p2 = scmp.ne.s32.totalorder %s2963_s18, %s2959_s17 }
  0x1b   : > { %p65_p3 = scmp.eq.s32.totalorder %s64_s27, 0  ;;  %p80_p4 = scmp.ne.s32.totalorder %s2959_s17, %s2955_s16 }
  0x1c   : > { %p3118_p5 = por %p74_p2, %p4452_p0  ;;  %p4447_p8 = scmp.lt.s32.totalorder %s2979_s22, 2 }
  0x1d   : > { %s3124_s29 = scalar_select %p65_p3, %s2963_s18, %s67_s26  }
  0x1e   : > { %p3128_p7 = por %p80_p4, %p4451_p1  ;;  %s3134_s11 = sshll.u32 %s2979_s22, 4 }
  0x1f   : > { %4500 = sst [smem:[#allocation24_spill]] %s3124_s29  ;;  %s348_s12 = sand.u32 1, %s2979_s22  }
  0x20   : > { %s350_s16 = sand.u32 1, %s2963_s18   ;;  %s4502_s1 = sld [smem:[#allocation50_spill]] }
  0x21   : > { %s2457_s25 = sshll.u32 %s350_s16, 4  ;;  %p3146_p9 = pnand %p4447_p8, %p3118_p5 }
  0x22   : > { %s352_s29 = scalar_lea.vmem [#allocation7], %s2457_s25  ;;  %p2464_p10 = scmp.ge.s32.totalorder %s2979_s22, 1 }
  0x23   : > { %s362_s6 = sshll.u32 %s352_s29, 4  ;;  %p408_p11 = scmp.lt.s32.totalorder %s2979_s22, 3  ;;  %s363_s6 = int_to_ptr.vmem [resolvable:$true] %s362_s6 }
  0x24   : > { %s3152_s16 = scalar_lea.sflag [#allocation8], %s348_s12  ;;  %p2737_p13 = pneg %p3146_p9 }
  0x26   : > { %s2352_s8 = scalar_lea.hbm %s4502_s1, %s3134_s11  ;;  %s2740_s28 = scalar_lea.hbm %s4502_s1, 64 }
  0x27   : > { %s2353_s7 = scalar_lea.hbm %s2352_s8, 16 }
  0x28   : > { %s360_s26 = sshll.u32 %s2353_s7, 4  ;;  %s361_s26 = int_to_ptr.hbm [resolvable:$true] %s360_s26 }
  0x29   : > { %s2733_s18 = sshra.s32 %s361_s26, 4  ;;  %s2734_s18 = int_to_ptr.hbm [resolvable:$true] %s2733_s18 }
  0x2a   : > { %s2735_s10 = scalar_lea.hbm %s2734_s18, 16  ;;  %p2741_p4 = scmp.lt.s32.totalorder %s2734_s18, %s4502_s1 }
  0x2b   : > { %p2736_p12 = scmp.ne.s32.totalorder %s2734_s18, %s2735_s10  ;;  %p2742_p5 = scmp.lt.s32.totalorder %s2740_s28, %s2735_s10 }
  0x2d   : > { %p2738_p2 = pnand %p2737_p13, %p2736_p12  ;;  %p2743_p6 = por %p2742_p5, %p2741_p4 }
  0x2f   : > { %p2739_p3 = pneg %p2738_p2 }
  0x31   : > { %p2744_p8 = pnand %p2743_p6, %p2739_p3 }
  0x33   : > { %2747 = shalt.err (!%p2744_p8)
}
  0x34   : > { %2620 = dma.hbm_to_vmem [thread:$0]  (!%p3146_p9), %s361_s26, 256, %s363_s6, %s3152_s16  }
  0x35   : > { %p3169_p6 = pnand %p2464_p10, %p408_p11  ;;  %s2451_s18 = sadd.s32 4294967294, %s2979_s22  }
  0x36   : > { %s36_s12 = ssub.s32 %s2979_s22, %s3106_s24  ;;  %s39_s27 = sadd.s32 1, %s2975_s21 }
  0x37   : > { %p37_p8 = scmp.eq.s32.totalorder %s36_s12, 0  ;;  %p46_p12 = scmp.ne.s32.totalorder %s2975_s21, %s2971_s20 }
  0x38   : > { %p52_p13 = scmp.ne.s32.totalorder %s2971_s20, %s2967_s19  ;;  %p284_p2 = scmp.eq.s32.totalorder %s3103_s23, 1 }
  0x39   : > { %s3183_s10 = scalar_select %p37_p8, %s2975_s21, %s39_s27  }
  0x3a   : > { %p48_p3 = por %p4452_p0, %p46_p12  ;;  %p3189_p9 = por %p4451_p1, %p52_p13 }
  0x3b   : > { %4505 = sst [smem:[#allocation25_spill]] %s3183_s10  ;;  %p3193_p10 = por %p284_p2, %p46_p12 }
  0x3c   : > { %p290_p11 = scmp.eq.s32.totalorder %s2451_s18, 1  ;;  %s3198_s7 = sand.u32 1, %s2975_s21  }
  0x3d   : > { %s4507_s26 = scalar_select %p3193_p10, 1, 0 }
  0x3e   : > { %s4509_s0 = sld [smem:[#allocation49_spill]]  ;;  %p3204_p4 = por %p290_p11, %p52_p13 }
  0x3f   : > { %4508 = sst [smem:[#allocation26_spill]] %s4507_s26  ;;  %s2454_s12 = sshll.u32 %s3198_s7, 4 }
  0x40   : > { %s4510_s25 = scalar_select %p3204_p4, 1, 0 }
  0x41   : > { %s332_s1 = scalar_lea.vmem [#allocation4], %s2454_s12  ;;  %p4512_p5 = scmp.lt.s32.totalorder %s2979_s22, 2 }
  0x42   : > { %4511 = sst [smem:[#allocation27_spill]] %s4510_s25  ;;  %s341_s10 = sshll.u32 %s332_s1, 4  ;;  %s342_s10 = int_to_ptr.vmem [resolvable:$true] %s341_s10 }
  0x43   : > { %p3211_p8 = pnand %p4512_p5, %p48_p3  ;;  %s329_s8 = scalar_lea.sflag [#allocation5], %s3198_s7 }
  0x44   : > { %s337_s29 = scalar_lea.hbm %s4509_s0, %s3134_s11  ;;  %s2770_s12 = scalar_lea.hbm %s4509_s0, 64 }
  0x45   : > { %s339_s27 = sshll.u32 %s337_s29, 4  ;;  %p4455_p13 = pneg %p3211_p8  ;;  %s340_s27 = int_to_ptr.hbm [resolvable:$true] %s339_s27 }
  0x46   : > { %s2763_s28 = sshra.s32 %s340_s27, 4  ;;  %s2764_s28 = int_to_ptr.hbm [resolvable:$true] %s2763_s28 }
  0x47   : > { %s2765_s21 = scalar_lea.hbm %s2764_s28, 16  ;;  %p2771_p3 = scmp.lt.s32.totalorder %s2764_s28, %s4509_s0 }
  0x48   : > { %p2766_p12 = scmp.ne.s32.totalorder %s2764_s28, %s2765_s21  ;;  %p2772_p5 = scmp.lt.s32.totalorder %s2770_s12, %s2765_s21 }
  0x4a   : > { %p2768_p2 = pnand %p4455_p13, %p2766_p12  ;;  %p2773_p1 = por %p2772_p5, %p2771_p3 }
  0x4c   : > { %p2769_p11 = pneg %p2768_p2 }
  0x4e   : > { %p2774_p0 = pnand %p2773_p1, %p2769_p11 }
  0x50   : > { %2777 = shalt.err (!%p2774_p0)
}
  0x51   : > { %2617 = dma.hbm_to_vmem [thread:$0]  (!%p3211_p8), %s340_s27, 256, %s342_s10, %s329_s8  }
  0x52   : > { %s90_s19 = sadd.s32 2, %s2979_s22  ;;  %s91_s21 = sadd.s32 2, %s3106_s24 }
  0x53   : > { %s92_s25 = ssub.s32 %s90_s19, %s91_s21  ;;  %s95_s28 = sadd.s32 1, %s2951_s15 }
  0x54   : > { %p93_p0 = scmp.eq.s32.totalorder %s92_s25, 0  ;;  %p102_p1 = scmp.ne.s32.totalorder %s2951_s15, %s2947_s14 }
  0x55   : > { %p108_p12 = scmp.ne.s32.totalorder %s2947_s14, %s2943_s13  ;;  %s371_s1 = sand.u32 1, %s2951_s15  }
  0x56   : > { %s3238_s29 = scalar_select %p93_p0, %s2951_s15, %s95_s28  }
  0x57   : > { %p4515_p2 = scmp.eq.s32.totalorder %s2979_s22, 0  ;;  %p4516_p3 = scmp.eq.s32.totalorder %s3103_s23, 0 }
  0x58   : > { %4514 = sst [smem:[#allocation28_spill]] %s3238_s29  ;;  %s2459_s10 = sshll.u32 %s371_s1, 4 }
  0x59   : > { %p104_p11 = por %p102_p1, %p4515_p2  ;;  %p3244_p5 = por %p108_p12, %p4516_p3 }
  0x5a   : > { %s2358_s19 = scalar_lea.hbm %s4435_s2, %s3134_s11  ;;  %s373_s0 = scalar_lea.vmem [#allocation9], %s2459_s10 }
  0x5b   : > { %s2359_s21 = scalar_lea.hbm %s2358_s19, 32  ;;  %s383_s24 = sshll.u32 %s373_s0, 4  ;;  %s384_s24 = int_to_ptr.vmem [resolvable:$true] %s383_s24 }
  0x5c   : > { %s381_s25 = sshll.u32 %s2359_s21, 4  ;;  %p4518_p0 = scmp.lt.s32.totalorder %s2979_s22, 2  ;;  %s382_s25 = int_to_ptr.hbm [resolvable:$true] %s381_s25 }
  0x5d   : > { %s2461_s28 = sshll.u32 %s3198_s7, 5  ;;  %s2498_s29 = sshll.u32 %s2979_s22, 5 }
  0x5e   : > { %p3254_p13 = pnand %p4518_p0, %p104_p11  ;;  %s2793_s15 = sshra.s32 %s382_s25, 4  ;;  %s2794_s15 = int_to_ptr.hbm [resolvable:$true] %s2793_s15 }
  0x5f   : > { %s2795_s1 = scalar_lea.hbm %s2794_s15, 16  ;;  %s2800_s10 = scalar_lea.hbm %s4435_s2, 64 }
  0x60   : > { %p2796_p1 = scmp.ne.s32.totalorder %s2794_s15, %s2795_s1  ;;  %p2797_p12 = pneg %p3254_p13 }
  0x61   : > { %p2801_p11 = scmp.lt.s32.totalorder %s2794_s15, %s4435_s2  ;;  %p2802_p0 = scmp.lt.s32.totalorder %s2800_s10, %s2795_s1 }
  0x62   : > { %p2798_p2 = pnand %p2797_p12, %p2796_p1 }
  0x63   : > { %p2803_p4 = por %p2802_p0, %p2801_p11 }
  0x64   : > { %p2799_p3 = pneg %p2798_p2 }
  0x66   : > { %p2804_p10 = pnand %p2803_p4, %p2799_p3 }
  0x68   : > { %2807 = shalt.err (!%p2804_p10)
}
  0x69   : > { %2623 = dma.hbm_to_vmem [thread:$0]  (!%p3254_p13), %s382_s25, 256, %s384_s24, %s3152_s16  }
  0x6a   : > { %s399_s22 = scalar_lea.hbm %s4436_s3, %s2498_s29  ;;  %s394_s11 = scalar_lea.vmem [#allocation10], %s2461_s28 }
  0x6b   : > { %s403_s0 = sshll.u32 %s394_s11, 4  ;;  %s401_s26 = sshll.u32 %s399_s22, 4  ;;  %s404_s0 = int_to_ptr.vmem [resolvable:$true] %s403_s0  ;;  %s402_s26 = int_to_ptr.hbm [resolvable:$true] %s401_s26 }
  0x6c   : > { %s391_s15 = scalar_lea.sflag [#allocation11], %s3198_s7  ;;  %s2823_s1 = sshra.s32 %s402_s26, 4  ;;  %s2824_s1 = int_to_ptr.hbm [resolvable:$true] %s2823_s1 }
  0x6d   : > { %s2825_s10 = scalar_lea.hbm %s2824_s1, 32  ;;  %p4520_p4 = pneg %p3211_p8 }
  0x6e   : > { %p2826_p10 = scmp.ne.s32.totalorder %s2824_s1, %s2825_s10  ;;  %s2830_s16 = scalar_lea.hbm %s4436_s3, 64 }
  0x6f   : > { %p2831_p13 = scmp.lt.s32.totalorder %s2824_s1, %s4436_s3  ;;  %p2832_p2 = scmp.lt.s32.totalorder %s2830_s16, %s2825_s10 }
  0x70   : > { %p2828_p1 = pnand %p2826_p10, %p4520_p4 }
  0x71   : > { %p2833_p3 = por %p2832_p2, %p2831_p13 }
  0x72   : > { %p2829_p12 = pneg %p2828_p1 }
  0x74   : > { %p2834_p11 = pnand %p2833_p3, %p2829_p12 }
  0x76   : > { %2837 = shalt.err (!%p2834_p11)
}
  0x77   : > { %2626 = dma.hbm_to_vmem [thread:$0]  (!%p3211_p8), %s402_s26, 512, %s404_s0, %s391_s15  }
  0x78   : > { %412 = sbr.rel (%p3169_p6) target bundleno = 1004 (0x3ec), region = 60 }
  0x7d   : > { %s3289_s22 = sand.u32 1, %s2971_s20  }
  0x7e   : > { %s2465_s7 = sshll.u32 %s3289_s22, 4  ;;  %s415_s28 = scalar_lea.sflag [#allocation5], %s3289_s22 }
  0x7f   : > { %s3295_s27 = scalar_lea.vmem [#allocation4], %s2465_s7 }
  0x80   : > { %2922 = dma.done.wait (%p3189_p9), %s415_s28, 256  }
  0x81   : > { %2924 = vsyncadd (%p3189_p9), %s415_s28, 4294967040  ;;  %s424_s9 = sand.u32 1, %s3103_s23   ;;  %s426_s26 = sand.u32 1, %s2959_s17  }
  0x82   : > { %s2466_s18 = sshll.u32 %s426_s26, 4  ;;  %s425_s8 = scalar_lea.sflag [#allocation8], %s424_s9 }
  0x83   : > { %s428_s19 = scalar_lea.vmem [#allocation7], %s2466_s18 }
  0x84   : > { %2926 = dma.done.wait (%p3128_p7), %s425_s8, 256  }
  0x85   : > { %2928 = vsyncadd (%p3128_p7), %s425_s8, 4294967040  ;;  %s436_s21 = sand.u32 1, %s2947_s14  }
  0x86   : > { %s3308_s11 = sshll.u32 %s436_s21, 4 }
  0x87   : > { %s438_s0 = scalar_lea.vmem [#allocation9], %s3308_s11 }
  0x88   : > { %2930 = dma.done.wait (%p3244_p5), %s425_s8, 256  }
  0x89   : > { %2932 = vsyncadd (%p3244_p5), %s425_s8, 4294967040  ;;  %s2468_s15 = sshll.u32 %s3289_s22, 5  ;;  %s445_s1 = scalar_lea.sflag [#allocation11], %s3289_s22 }
  0x8a   : > { %s3317_s10 = scalar_lea.vmem [#allocation10], %s2468_s15 }
  0x8b   : > { %2934 = dma.done.wait (%p3189_p9), %s445_s1, 512  }
  0x8c   : > { %2936 = vsyncadd (%p3189_p9), %s445_s1, 4294966784  ;;  %v4466_v0 = vmov 0   ;;  %v508_v1 = vld [vmem:[%s428_s19] sm:$0xff]  ;;  %v509_v2 = vld [vmem:[%s428_s19 + $0x8] sm:$0xff]  ;;  %vm4461_vm0 = vcmask 1043456   ;;  %vm526_vm1 = vcmask 31744  }
  0x8d   : > { %2731 = vset.pattern.permute.xlu0 %v4466_v0  ;;  %2732 = vset.pattern.permute.xlu2 %v4466_v0  ;;  %519 = vst [vmem:[#allocation1] ss:$2 sm:$0xff] %v508_v1  ;;  %v511_v3 = vld [vmem:[%s4438_s5] sm:$0xff]  ;;  %v643_v10 = vld [vmem:[%s438_s0] sm:$0xf]  ;;  %s2982_s6 = smov 71  }
  0x8e   : > { %521 = vst [vmem:[#allocation1 + $0x10] ss:$2 sm:$0xff] %v509_v2  ;;  %514 = vperm.xlu0 %2731, %v511_v3   ;;  %v510_v4 = vld [vmem:[%s4437_s4] sm:$0xff]  ;;  %s2983_s16 = smov 73   ;;  %s2984_s25 = smov 72   ;;  %vm1375_vm6 = vcmask 990208  }
  0x8f   : > { %v619_v7 = vld [vmem:[%s3295_s27 + $0xc] sm:$0xf]  ;;  %s2985_s29 = smov 65   ;;  %s2986_s28 = smov 127   ;;  %vm4474_vm8 = vcmask 1039360   ;;  %vm4462_vm13 = vcmask 596992  }
  0x90   : > { %s2987_s27 = smov 121   ;;  %s2988_s9 = smov 1   ;;  %v3482_v31 = vld [vmem:[%s3317_s10 + $0x1] ss:$8 sm:$0xf]  ;;  %vm1088_vm14 = vcmask 449536  }
  0x91   : > { %s2989_s26 = smov 7   ;;  %s2990_s18 = smov 9   ;;  %v3485_v32 = vld [vmem:[%s3317_s10 + $0x2] ss:$8 sm:$0xf]  ;;  %vm4471_vm3 = vcmp.lt.s32.totalorder %v3482_v31, 7 }
  0x92   : > { %s2991_s8 = smov 55   ;;  %s2992_s19 = smov 56   ;;  %vm685_vm2 = vcmp.ge.s32.totalorder %v3485_v32, 1  ;;  %vm780_vm5 = vcmp.lt.s32.totalorder %v3485_v32, 7 }
  0x93   : > { %s2993_s21 = smov 8   ;;  %s2994_s11 = smov 57   ;;  %vm1350_vm4 = vmand %vm4471_vm3, %vm685_vm2  ;;  %v3526_v45 = vsel %vm780_vm5, 1, %v4466_v0  ;;  %v3534_v49 = vld [vmem:[%s3317_s10] ss:$8 sm:$0xf] }
  0x94   : > { %v522_v5 = vld.sshfl [vmem:[#allocation1] sm:$0xff pattern:$0x75316420]  ;;  %v523_v6 = vld.sshfl [vmem:[#allocation1 + $0x8] sm:$0xff pattern:$0x75316420] }
  0x95   : > { %2470 = vmatpush.msk.msra.mxu0 %vm4461_vm0, %v522_v5  ;;  %2472 = vmatpush.msk.msra.mxu1 %vm4461_vm0, %v523_v6  ;;  %2269 = vst [vmem:[#allocation1] ss:$2 sm:$0xff] %v508_v1  ;;  %v524_v8 = vld.sshfl [vmem:[#allocation1 + $0x10] sm:$0xff pattern:$0x75316420]  ;;  %s2995_s0 = smov 63  }
  0x96   : > { %2474 = vmatpush.msk.msra.mxu2 %vm4461_vm0, %v524_v8  ;;  %v525_v9 = vld.sshfl [vmem:[#allocation1 + $0x18] sm:$0xff pattern:$0x75316420]  ;;  %2471 = vmatmul.msk.f32.vlgmr.msra.gmra.mxu0 %vm526_vm1, %v510_v4  ;;  %v3511_v40 = vsel %vm1350_vm4, 1, %v4466_v0  ;;  %v1305_v48 = vperm.slane %v3526_v45, 0  ;;  %vm4465_vm10 = vcmp.lt.s32.totalorder %v3534_v49, 7 }
  0x97   : > { %2476 = vmatpush.msk.msra.mxu3 %vm4461_vm0, %v525_v9  ;;  %2271 = vst [vmem:[#allocation1 + $0x10] ss:$2 sm:$0xff] %v509_v2  ;;  %2473 = vmatmul.msk.f32.vlgmr.msra.gmra.mxu1 %vm526_vm1, %v510_v4  ;;  %v1352_v42 = vperm.slane %v3511_v40, 0  ;;  %vm3555_vm11 = vmand %vm4465_vm10, %vm4471_vm3  ;;  %s2996_s15 = smov 64   ;;  %s2997_s1 = smov 119  }
  0x98   : > { %2475 = vmatmul.msk.f32.vlgmr.msra.gmra.mxu2 %vm526_vm1, %v510_v4  ;;  %2477 = vmatmul.msk.f32.vlgmr.msra.gmra.mxu3 %vm526_vm1, %v510_v4  ;;  %4526 = vst [vmem:[#allocation34_spill] sm:$0xff] %v3511_v40  ;;  %vm1309_vm9 = vcmp.eq.s32.totalorder %v1305_v48, 1  ;;  %vm1858_vm12 = vmand %vm3555_vm11, %vm780_vm5  ;;  %v3584_v60 = vsel %vm3555_vm11, 1, %v4466_v0  ;;  %v3670_v48 = vsel %vm685_vm2, 1, %v4466_v0  ;;  %s2998_s10 = smov 120   ;;  %s4561_s13 = sld [smem:[#allocation54_spill]] }
  0x99   : > { %2478 = vmatpush.msk.msrb.mxu0 %vm4461_vm0, %v619_v7  ;;  %2480 = vmatpush.msk.msrb.mxu1 %vm4461_vm0, %v643_v10  ;;  %vm1356_vm7 = vcmp.eq.s32.totalorder %v1352_v42, 1  ;;  %v3575_v57 = vsel %vm1858_vm12, 1, %v4466_v0  ;;  %v1814_v62 = vperm.slane %v3584_v60, 0  ;;  %s4615_s30 = sld [smem:[#allocation26_spill]] }
  0x9a   : > { %4530 = vst [vmem:[#allocation36_spill] sm:$0xff] %v3575_v57  ;;  %v1860_v61 = vperm.slane %v3575_v57, 0 }
  0x9b   : > { %vm1818_vm4 = vcmp.eq.s32.totalorder %v1814_v62, 1 }
  0x9c   : > { %vm1864_vm15 = vcmp.eq.s32.totalorder %v1860_v61, 1 }
  0x9e   : > { %2479 = vmatmul.msk.f32.vlgmr.msrb.gmra.mxu0 %vm526_vm1, %v510_v4 }
  0x9f   : > { %2481 = vmatmul.msk.f32.vlgmr.msrb.gmra.mxu1 %vm526_vm1, %v510_v4  ;;  %vm1041_vm1 = vcmask 457728   ;;  %p4617_p6 = scmp.ne.s32.totalorder %s4615_s30, 0 }
 0x100   : > { %v3344_v11 = vpop.permute.xlu0 %514 }
 0x113   : > { %v556_v12 = vpop.f32.mrf.mxu0 }
 0x114   : > { %v3347_v13 = vadd.f32 %v556_v12, %v3344_v11  ;;  %v576_v14 = vpop.f32.mrf.mxu1 }
 0x115   : > { %v3350_v15 = vadd.f32 %v576_v14, %v3344_v11 }
 0x116   : > { %798 = vrot.lane.b32.xlu0 %v3347_v13, %s2982_s6  ;;  %704 = vrot.lane.b32.xlu1 %v3347_v13, %s2983_s16 }
 0x117   : > { %752 = vrot.lane.b32.xlu2 %v3350_v15, %s2984_s25 }
 0x11b   : > { %v596_v16 = vpop.f32.mrf.mxu2  ;;  %v616_v18 = vpop.f32.mrf.mxu3 }
 0x11c   : > { %v3407_v17 = vadd.f32 %v596_v16, %v3344_v11  ;;  %v3416_v19 = vadd.f32 %v616_v18, %v3344_v11  ;;  %v640_v25 = vpop.f32.mrf.mxu0  ;;  %v664_v36 = vpop.f32.mrf.mxu1 }
 0x11d   : > { %v3461_v27 = vadd.f32 %v640_v25, %v3344_v11  ;;  %v3494_v37 = vadd.f32 %v664_v36, %v3344_v11 }
 0x11e   : > { %847 = vrot.lane.b32.xlu0 %v3350_v15, %s2985_s29  ;;  %706 = vrot.lane.b32.xlu1 %v3350_v15, %s2983_s16 }
 0x11f   : > { %845 = vrot.lane.b32.xlu2 %v3347_v13, %s2985_s29 }
 0x126   : > { %1318 = vrot.lane.b32.xlu0 %v3347_v13, %s2986_s28  ;;  %750 = vrot.lane.b32.xlu1 %v3347_v13, %s2984_s25 }
 0x127   : > { %1367 = vrot.lane.b32.xlu2 %v3350_v15, %s2987_s27 }
 0x12e   : > { %1266 = vrot.lane.b32.xlu0 %v3347_v13, %s2988_s9  ;;  %800 = vrot.lane.b32.xlu1 %v3350_v15, %s2982_s6 }
 0x12f   : > { %1220 = vrot.lane.b32.xlu2 %v3347_v13, %s2989_s26 }
 0x136   : > { %1127 = vrot.lane.b32.xlu0 %v3347_v13, %s2990_s18  ;;  %1365 = vrot.lane.b32.xlu1 %v3347_v13, %s2987_s27 }
 0x137   : > { %1875 = vrot.lane.b32.xlu2 %v3350_v15, %s2991_s8 }
 0x13e   : > { %1829 = vrot.lane.b32.xlu0 %v3350_v15, %s2992_s19  ;;  %1320 = vrot.lane.b32.xlu1 %v3350_v15, %s2986_s28 }
 0x13f   : > { %1268 = vrot.lane.b32.xlu2 %v3350_v15, %s2988_s9 }
 0x146   : > { %1222 = vrot.lane.b32.xlu0 %v3350_v15, %s2989_s26  ;;  %1173 = vrot.lane.b32.xlu1 %v3347_v13, %s2993_s21 }
 0x147   : > { %1827 = vrot.lane.b32.xlu2 %v3347_v13, %s2992_s19 }
 0x14e   : > { %1782 = vrot.lane.b32.xlu0 %v3347_v13, %s2994_s11  ;;  %1873 = vrot.lane.b32.xlu1 %v3347_v13, %s2991_s8 }
 0x14f   : > { %1033 = vrot.lane.b32.xlu2 %v3347_v13, %s2992_s19 }
 0x156   : > { %987 = vrot.lane.b32.xlu0 %v3347_v13, %s2994_s11  ;;  %1080 = vrot.lane.b32.xlu1 %v3347_v13, %s2991_s8 }
 0x157   : > { %1737 = vrot.lane.b32.xlu2 %v3350_v15, %s2995_s0 }
 0x15e   : > { %754 = vrot.lane.b32.xlu0 %v3407_v17, %s2984_s25  ;;  %1784 = vrot.lane.b32.xlu1 %v3350_v15, %s2994_s11 }
 0x15f   : > { %708 = vrot.lane.b32.xlu2 %v3407_v17, %s2983_s16 }
 0x166   : > { %804 = vrot.lane.b32.xlu0 %v3416_v19, %s2982_s6  ;;  %1175 = vrot.lane.b32.xlu1 %v3350_v15, %s2993_s21 }
 0x167   : > { %710 = vrot.lane.b32.xlu2 %v3416_v19, %s2983_s16 }
 0x16e   : > { %1369 = vrot.lane.b32.xlu0 %v3407_v17, %s2987_s27  ;;  %1735 = vrot.lane.b32.xlu1 %v3347_v13, %s2995_s0 }
 0x16f   : > { %802 = vrot.lane.b32.xlu2 %v3407_v17, %s2982_s6 }
 0x171   : > { %v3430_v20 = vpop.permute.xlu2 %752 }
 0x172   : > { %4521 = vst [vmem:[#allocation29_spill] sm:$0xff] %v3430_v20 }
 0x176   : > { %1324 = vrot.lane.b32.xlu0 %v3416_v19, %s2986_s28  ;;  %756 = vrot.lane.b32.xlu1 %v3416_v19, %s2984_s25 }
 0x177   : > { %1322 = vrot.lane.b32.xlu2 %v3407_v17, %s2986_s28 }
 0x179   : > { %v3438_v21 = vpop.permute.xlu2 %845 }
 0x17e   : > { %1270 = vrot.lane.b32.xlu0 %v3407_v17, %s2988_s9  ;;  %1371 = vrot.lane.b32.xlu1 %v3416_v19, %s2987_s27 }
 0x17f   : > { %1226 = vrot.lane.b32.xlu2 %v3416_v19, %s2989_s26 }
 0x181   : > { %v3446_v22 = vpop.permute.xlu2 %1367 }
 0x186   : > { %1179 = vrot.lane.b32.xlu0 %v3416_v19, %s2993_s21  ;;  %1272 = vrot.lane.b32.xlu1 %v3416_v19, %s2988_s9 }
 0x187   : > { %1177 = vrot.lane.b32.xlu2 %v3407_v17, %s2993_s21 }
 0x188   : > { %v3454_v23 = vpop.permute.xlu0 %798  ;;  %v3456_v24 = vpop.permute.xlu1 %704 }
 0x189   : > { %v3458_v26 = vpop.permute.xlu2 %1220 }
 0x18e   : > { %702 = vrot.lane.b32.xlu0 %v3461_v27, %s2983_s16  ;;  %1224 = vrot.lane.b32.xlu1 %v3407_v17, %s2989_s26 }
 0x18f   : > { %796 = vrot.lane.b32.xlu2 %v3461_v27, %s2982_s6 }
 0x190   : > { %v3469_v28 = vpop.permute.xlu0 %847  ;;  %v3471_v29 = vpop.permute.xlu1 %706 }
 0x191   : > { %4522 = vst [vmem:[#allocation30_spill] sm:$0xff] %v3469_v28  ;;  %v3473_v30 = vpop.permute.xlu2 %1875 }
 0x192   : > { %4523 = vst [vmem:[#allocation31_spill] sm:$0xff] %v3471_v29 }
 0x196   : > { %748 = vrot.lane.b32.xlu0 %v3461_v27, %s2984_s25  ;;  %843 = vrot.lane.b32.xlu1 %v3461_v27, %s2985_s29 }
 0x197   : > { %1264 = vrot.lane.b32.xlu2 %v3461_v27, %s2988_s9 }
 0x198   : > { %v1319_v33 = vpop.permute.xlu0 %1318  ;;  %v3487_v34 = vpop.permute.xlu1 %750 }
 0x199   : > { %v3489_v35 = vpop.permute.xlu2 %1268 }
 0x19a   : > { %4524 = vst [vmem:[#allocation32_spill] sm:$0xff] %v3489_v35 }
 0x19e   : > { %1171 = vrot.lane.b32.xlu0 %v3461_v27, %s2993_s21  ;;  %1218 = vrot.lane.b32.xlu1 %v3461_v27, %s2989_s26  ;;  %s4591_s26 = sld [smem:[#allocation52_spill]]  ;;  %s500_s21 = scalar_lea.vmem [#allocation12], %s2465_s7 }
 0x19f   : > { %1373 = vrot.lane.b32.xlu2 %v3494_v37, %s2987_s27  ;;  %s2310_s12 = sshll.u32 %s500_s21, 4  ;;  %s2311_s12 = int_to_ptr.vmem [resolvable:$true] %s2310_s12 }
 0x1a0   : > { %v3506_v38 = vpop.permute.xlu0 %1266  ;;  %v3508_v39 = vpop.permute.xlu1 %800 }
 0x1a1   : > { %4525 = vst [vmem:[#allocation33_spill] sm:$0xff] %v3508_v39  ;;  %v1828_v41 = vpop.permute.xlu2 %1827 }
 0x1a6   : > { %1078 = vrot.lane.b32.xlu0 %v3461_v27, %s2991_s8  ;;  %1326 = vrot.lane.b32.xlu1 %v3494_v37, %s2986_s28 }
 0x1a7   : > { %1125 = vrot.lane.b32.xlu2 %v3461_v27, %s2990_s18 }
 0x1a8   : > { %v3521_v43 = vpop.permute.xlu0 %1127  ;;  %v1366_v44 = vpop.permute.xlu1 %1365 }
 0x1a9   : > { %v3528_v46 = vpop.permute.xlu2 %1033  ;;  %v1376_v47 = vsel %vm1375_vm6, %v1366_v44, %v3446_v22  ;;  %v1353_v44 = vperm.slane %v3511_v40, 1 }
 0x1aa   : > { %2500 = vmatpush.msk.msrb.mxu2 %vm1356_vm7, %v1376_v47  ;;  %vm1767_vm7 = vmand %vm3555_vm11, %vm685_vm2  ;;  %vm995_vm11 = vcmask 465920   ;;  %v1306_v47 = vperm.slane %v3526_v45, 1 }
 0x1ab   : > { %v3616_v8 = vsel %vm1767_vm7, 1, %v4466_v0  ;;  %vm4464_vm7 = vcmask 515072   ;;  %vm1357_vm0 = vcmp.eq.s32.totalorder %v1353_v44, 1 }
 0x1ac   : > { %v1769_v11 = vperm.slane %v3616_v8, 0 }
 0x1ae   : > { %936 = vrot.lane.b32.xlu0 %v3461_v27, %s2995_s0  ;;  %1031 = vrot.lane.b32.xlu1 %v3461_v27, %s2992_s19  ;;  %vm1773_vm12 = vcmp.eq.s32.totalorder %v1769_v11, 1 }
 0x1af   : > { %985 = vrot.lane.b32.xlu2 %v3461_v27, %s2994_s11 }
 0x1b0   : > { %v3543_v50 = vpop.permute.xlu0 %1829  ;;  %v3545_v51 = vpop.permute.xlu1 %1320 }
 0x1b1   : > { %v3547_v52 = vpop.permute.xlu2 %1737  ;;  %v1329_v53 = vsel %vm4474_vm8, %v1319_v33, %v3545_v51  ;;  %v1837_v5 = vsel %vm1041_vm1, %v1828_v41, %v3543_v50 }
 0x1b2   : > { %2501 = vmatpush.msk.msrb.mxu2 %vm1309_vm9, %v1329_v53  ;;  %vm4463_vm9 = vcmask 580608  }
 0x1b4   : > { %2021 = vmatpush.msrb.mxu2 %v3347_v13 }
 0x1b6   : > { %1131 = vrot.lane.b32.xlu0 %v3407_v17, %s2990_s18  ;;  %938 = vrot.lane.b32.xlu1 %v3347_v13, %s2995_s0 }
 0x1b7   : > { %1129 = vrot.lane.b32.xlu2 %v3350_v15, %s2990_s18 }
 0x1b8   : > { %v3570_v55 = vpop.permute.xlu0 %1222  ;;  %v3572_v56 = vpop.permute.xlu1 %1173 }
 0x1b9   : > { %4529 = vst [vmem:[#allocation35_spill] sm:$0xff] %v3570_v55  ;;  %v709_v58 = vpop.permute.xlu2 %708 }
 0x1ba   : > { %v3579_v59 = vsel %vm4462_vm13, %v3471_v29, %v709_v58 }
 0x1bb   : > { %4531 = vst [vmem:[#allocation37_spill] sm:$0xff] %v3579_v59 }
 0x1be   : > { %1691 = vrot.lane.b32.xlu0 %v3350_v15, %s2996_s15  ;;  %1133 = vrot.lane.b32.xlu1 %v3416_v19, %s2990_s18 }
 0x1bf   : > { %1689 = vrot.lane.b32.xlu2 %v3347_v13, %s2996_s15 }
 0x1c0   : > { %v1783_v63 = vpop.permute.xlu0 %1782  ;;  %v1874_v1 = vpop.permute.xlu1 %1873 }
 0x1c1   : > { %v711_v2 = vpop.permute.xlu2 %710  ;;  %v1883_v3 = vsel %vm1088_vm14, %v1874_v1, %v3473_v30 }
 0x1c2   : > { %v3597_v4 = vsel %vm4462_vm13, %v709_v58, %v711_v2  ;;  %2515 = vmatpush.msk.msrb.mxu3 %vm1864_vm15, %v1883_v3  ;;  %vm1720_vm15 = vmand %vm4465_vm10, %vm780_vm5  ;;  %vm4483_vm13 = vcmask 64512   ;;  %v1252_v2 = vperm.slane %v3670_v48, 1 }
 0x1c3   : > { %4532 = vst [vmem:[#allocation38_spill] sm:$0xff] %v3597_v4  ;;  %v3646_v33 = vsel %vm1720_vm15, 1, %v4466_v0  ;;  %v1861_v4 = vperm.slane %v3575_v57, 1 }
 0x1c4   : > { %2516 = vmatpush.msk.msrb.mxu3 %vm1818_vm4, %v1837_v5  ;;  %v1722_v42 = vperm.slane %v3646_v33, 0  ;;  %vm684_vm4 = vcmp.ge.s32.totalorder %v3482_v31, 1 }
 0x1c6   : > { %891 = vrot.lane.b32.xlu0 %v3347_v13, %s2996_s15  ;;  %1877 = vrot.lane.b32.xlu1 %v3407_v17, %s2991_s8  ;;  %vm1726_vm15 = vcmp.eq.s32.totalorder %v1722_v42, 1 }
 0x1c7   : > { %889 = vrot.lane.b32.xlu2 %v3461_v27, %s2996_s15 }
 0x1c8   : > { %v3611_v6 = vpop.permute.xlu0 %987  ;;  %v3613_v7 = vpop.permute.xlu1 %1080 }
 0x1c9   : > { %v803_v9 = vpop.permute.xlu2 %802 }
 0x1ca   : > { %v3620_v10 = vsel %vm4463_vm9, %v3508_v39, %v803_v9 }
 0x1cb   : > { %4533 = vst [vmem:[#allocation39_spill] sm:$0xff] %v3620_v10 }
 0x1ce   : > { %1086 = vrot.lane.b32.xlu0 %v3416_v19, %s2991_s8  ;;  %1082 = vrot.lane.b32.xlu1 %v3350_v15, %s2991_s8 }
 0x1cf   : > { %1084 = vrot.lane.b32.xlu2 %v3407_v17, %s2991_s8 }
 0x1d0   : > { %v3629_v12 = vpop.permute.xlu0 %754  ;;  %v3631_v14 = vpop.permute.xlu1 %1784 }
 0x1d1   : > { %4534 = vst [vmem:[#allocation40_spill] sm:$0xff] %v3629_v12  ;;  %v1323_v16 = vpop.permute.xlu2 %1322  ;;  %v1792_v18 = vsel %vm995_vm11, %v1783_v63, %v3631_v14 }
 0x1d2   : > { %2517 = vmatpush.msk.msrb.mxu3 %vm1773_vm12, %v1792_v18  ;;  %vm1203_vm12 = vmand %vm684_vm4, %vm780_vm5  ;;  %v1330_v3 = vsel %vm4474_vm8, %v3545_v51, %v1323_v16 }
 0x1d3   : > { %v3677_v63 = vsel %vm1203_vm12, 1, %v4466_v0  ;;  %vm4469_vm12 = vcmask 7168  }
 0x1d4   : > { %v1206_v5 = vperm.slane %v3677_v63, 1  ;;  %v1276_v51 = vsel %vm4469_vm12, %v3506_v38, %v3489_v35 }
 0x1d6   : > { %1831 = vrot.lane.b32.xlu0 %v3407_v17, %s2992_s19  ;;  %1644 = vrot.lane.b32.xlu1 %v3347_v13, %s2985_s29 }
 0x1d7   : > { %1646 = vrot.lane.b32.xlu2 %v3350_v15, %s2985_s29 }
 0x1d8   : > { %v805_v25 = vpop.permute.xlu0 %804  ;;  %v1176_v27 = vpop.permute.xlu1 %1175 }
 0x1d9   : > { %v3648_v36 = vpop.permute.xlu2 %1226  ;;  %v3651_v41 = vsel %vm4463_vm9, %v803_v9, %v805_v25  ;;  %vm1310_vm9 = vcmp.eq.s32.totalorder %v1306_v47, 1 }
 0x1da   : > { %4535 = vst [vmem:[#allocation41_spill] sm:$0xff] %v3651_v41 }
 0x1de   : > { %1039 = vrot.lane.b32.xlu0 %v3416_v19, %s2992_s19  ;;  %1035 = vrot.lane.b32.xlu1 %v3350_v15, %s2992_s19 }
 0x1df   : > { %1037 = vrot.lane.b32.xlu2 %v3407_v17, %s2992_s19 }
 0x1e0   : > { %v1370_v53 = vpop.permute.xlu0 %1369  ;;  %v1736_v54 = vpop.permute.xlu1 %1735 }
 0x1e1   : > { %v1178_v58 = vpop.permute.xlu2 %1177  ;;  %v1377_v61 = vsel %vm1375_vm6, %v3446_v22, %v1370_v53  ;;  %v1745_v62 = vsel %vm4464_vm7, %v1736_v54, %v3547_v52  ;;  %v3688_v22 = vsel %vm684_vm4, 1, %v4466_v0  ;;  %vm4476_vm7 = vcmask 588800  }
 0x1e2   : > { %v3680_v1 = vsel %vm4483_vm13, %v1176_v27, %v1178_v58  ;;  %2518 = vmatpush.msk.msrb.mxu3 %vm1726_vm15, %v1745_v62  ;;  %2526 = vmatpush.msk.msra.mxu0 %vm1357_vm0, %v1377_v61  ;;  %vm1256_vm0 = vcmp.eq.s32.totalorder %v1252_v2, 1  ;;  %v1159_v9 = vperm.slane %v3688_v22, 1  ;;  %vm4484_vm15 = vcmask 56320  }
 0x1e3   : > { %4536 = vst [vmem:[#allocation42_spill] sm:$0xff] %v3680_v1  ;;  %v1230_v47 = vsel %vm4484_vm15, %v3458_v26, %v3570_v55  ;;  %v1183_v54 = vsel %vm4483_vm13, %v3572_v56, %v1176_v27  ;;  %v1251_v61 = vperm.slane %v3670_v48, 0  ;;  %v1158_v59 = vperm.slane %v3688_v22, 0 }
 0x1e4   : > { %2527 = vmatpush.msk.msra.mxu0 %vm1310_vm9, %v1330_v3  ;;  %vm1210_vm9 = vcmp.eq.s32.totalorder %v1206_v5, 1  ;;  %vm1163_vm10 = vcmp.eq.s32.totalorder %v1159_v9, 1  ;;  %v4544_v1 = vmov 0  }
 0x1e6   : > { %1786 = vrot.lane.b32.xlu0 %v3407_v17, %s2994_s11  ;;  %1598 = vrot.lane.b32.xlu1 %v3347_v13, %s2982_s6 }
 0x1e7   : > { %1600 = vrot.lane.b32.xlu2 %v3350_v15, %s2982_s6  ;;  %2061 = vmatpush.msra.mxu0 %v3350_v15 }
 0x1e8   : > { %v3702_v11 = vpop.permute.xlu0 %1324  ;;  %v757_v18 = vpop.permute.xlu1 %756 }
 0x1e9   : > { %v3704_v25 = vpop.permute.xlu2 %796  ;;  %v3708_v42 = vsel %vm4474_vm8, %v1323_v16, %v3702_v11  ;;  %2528 = vmatpush.msk.msra.mxu0 %vm1256_vm0, %v1276_v51  ;;  %v3712_v44 = vsel %vm4476_vm7, %v3629_v12, %v757_v18  ;;  %vm1255_vm0 = vcmp.eq.s32.totalorder %v1251_v61, 1  ;;  %vm1162_vm8 = vcmp.eq.s32.totalorder %v1158_v59, 1 }
 0x1ea   : > { %4537 = vst [vmem:[#allocation43_spill] sm:$0xff] %v3708_v42 }
 0x1eb   : > { %4538 = vst [vmem:[#allocation44_spill] sm:$0xff] %v3712_v44  ;;  %2529 = vmatpush.msk.msra.mxu0 %vm1210_vm9, %v1230_v47 }
 0x1ed   : > { %2530 = vmatpush.msk.msra.mxu0 %vm1163_vm10, %v1183_v54  ;;  %vm683_vm10 = vcmp.ge.s32.totalorder %v3534_v49, 1 }
 0x1ee   : > { %993 = vrot.lane.b32.xlu0 %v3416_v19, %s2994_s11  ;;  %989 = vrot.lane.b32.xlu1 %v3350_v15, %s2994_s11  ;;  %vm3786_vm9 = vmand %vm683_vm10, %vm4471_vm3  ;;  %vm1135_vm3 = vcmask 72704  }
 0x1ef   : > { %991 = vrot.lane.b32.xlu2 %v3407_v17, %s2994_s11 }
 0x1f0   : > { %v3726_v16 = vpop.permute.xlu0 %1270  ;;  %v1372_v62 = vpop.permute.xlu1 %1371 }
 0x1f1   : > { %4539 = vst [vmem:[#allocation45_spill] sm:$0xff] %v3726_v16  ;;  %v1265_v2 = vpop.permute.xlu2 %1264  ;;  %v3729_v3 = vsel %vm1375_vm6, %v1370_v53, %v1372_v62 }
 0x1f2   : > { %4540 = vst [vmem:[#allocation46_spill] sm:$0xff] %v3729_v3  ;;  %v1275_v27 = vsel %vm4469_vm12, %v1265_v2, %v3506_v38 }
 0x1f3   : > { %2502 = vmatpush.msk.msrb.mxu2 %vm1255_vm0, %v1275_v27  ;;  %vm1063_vm0 = vmand %vm3786_vm9, %vm780_vm5 }
 0x1f4   : > { %v3805_v55 = vsel %vm1063_vm0, 1, %v4544_v1 }
 0x1f5   : > { %v1066_v28 = vperm.slane %v3805_v55, 1 }
 0x1f6   : > { %1739 = vrot.lane.b32.xlu0 %v3407_v17, %s2995_s0  ;;  %1552 = vrot.lane.b32.xlu1 %v3347_v13, %s2984_s25 }
 0x1f7   : > { %1554 = vrot.lane.b32.xlu2 %v3350_v15, %s2984_s25 }
 0x1f8   : > { %v1180_v5 = vpop.permute.xlu0 %1179  ;;  %v1273_v9 = vpop.permute.xlu1 %1272 }
 0x1f9   : > { %v1374_v51 = vpop.permute.xlu2 %1373  ;;  %v3740_v18 = vsel %vm4483_vm13, %v1178_v58, %v1180_v5  ;;  %v3744_v53 = vsel %vm4469_vm12, %v3726_v16, %v1273_v9  ;;  %v1205_v9 = vperm.slane %v3677_v63, 0 }
 0x1fa   : > { %v3747_v38 = vsel %vm1375_vm6, %v1372_v62, %v1374_v51  ;;  %vm1110_vm6 = vmand %vm684_vm4, %vm685_vm2 }
 0x1fb   : > { %v3780_v27 = vsel %vm1110_vm6, 1, %v4466_v0  ;;  %vm1209_vm6 = vcmp.eq.s32.totalorder %v1205_v9, 1 }
 0x1fc   : > { %v1113_v51 = vperm.slane %v3780_v27, 1  ;;  %v1112_v10 = vperm.slane %v3780_v27, 0 }
 0x1fe   : > { %940 = vrot.lane.b32.xlu0 %v3350_v15, %s2995_s0  ;;  %1879 = vrot.lane.b32.xlu1 %v3416_v19, %s2991_s8  ;;  %vm1117_vm12 = vcmp.eq.s32.totalorder %v1113_v51, 1  ;;  %v1065_v51 = vperm.slane %v3805_v55, 0  ;;  %vm1116_vm7 = vcmp.eq.s32.totalorder %v1112_v10, 1 }
 0x1ff   : > { %1881 = vrot.lane.b32.xlu2 %v3494_v37, %s2991_s8 }
 0x200   : > { %v3755_v47 = vpop.permute.xlu0 %702  ;;  %v3757_v58 = vpop.permute.xlu1 %1224 }
 0x201   : > { %4541 = vst [vmem:[#allocation47_spill] sm:$0xff] %v3757_v58  ;;  %v1126_v54 = vpop.permute.xlu2 %1125  ;;  %v3762_v61 = vsel %vm4484_vm15, %v3757_v58, %v3648_v36 }
 0x206   : > { %1507 = vrot.lane.b32.xlu0 %v3347_v13, %s2983_s16  ;;  %942 = vrot.lane.b32.xlu1 %v3407_v17, %s2995_s0 }
 0x207   : > { %944 = vrot.lane.b32.xlu2 %v3416_v19, %s2995_s0 }
 0x208   : > { %v3775_v62 = vpop.permute.xlu0 %748  ;;  %v3777_v36 = vpop.permute.xlu1 %843 }
 0x209   : > { %v986_v2 = vpop.permute.xlu2 %985 }
 0x20e   : > { %1833 = vrot.lane.b32.xlu0 %v3416_v19, %s2992_s19  ;;  %1509 = vrot.lane.b32.xlu1 %v3350_v15, %s2983_s16 }
 0x20f   : > { %1693 = vrot.lane.b32.xlu2 %v3407_v17, %s2996_s15 }
 0x210   : > { %v1172_v0 = vpop.permute.xlu0 %1171  ;;  %v1219_v12 = vpop.permute.xlu1 %1218 }
 0x211   : > { %v1130_v58 = vpop.permute.xlu2 %1129  ;;  %v1229_v35 = vsel %vm4484_vm15, %v1219_v12, %v3458_v26  ;;  %v1182_v9 = vsel %vm4483_vm13, %v1172_v0, %v3572_v56  ;;  %v1136_v26 = vsel %vm1135_vm3, %v1126_v54, %v3521_v43  ;;  %v3831_v56 = vsel %vm3786_vm9, 1, %v4544_v1 }
 0x212   : > { %v1137_v16 = vsel %vm1135_vm3, %v3521_v43, %v1130_v58  ;;  %2503 = vmatpush.msk.msrb.mxu2 %vm1209_vm6, %v1229_v35  ;;  %v1018_v12 = vperm.slane %v3831_v56, 0  ;;  %vm1070_vm13 = vcmp.eq.s32.totalorder %v1066_v28, 1 }
 0x213   : > { %2531 = vmatpush.msk.msra.mxu0 %vm1117_vm12, %v1137_v16  ;;  %vm1069_vm12 = vcmp.eq.s32.totalorder %v1065_v51, 1 }
 0x214   : > { %2504 = vmatpush.msk.msrb.mxu2 %vm1162_vm8, %v1182_v9  ;;  %vm970_vm8 = vmand %vm3786_vm9, %vm685_vm2  ;;  %vm1022_vm9 = vcmp.eq.s32.totalorder %v1018_v12, 1 }
 0x215   : > { %v3836_v10 = vsel %vm970_vm8, 1, %v4544_v1  ;;  %vm4547_vm8 = vcmask 515072  }
 0x216   : > { %895 = vrot.lane.b32.xlu0 %v3407_v17, %s2996_s15  ;;  %1835 = vrot.lane.b32.xlu1 %v3494_v37, %s2992_s19  ;;  %v972_v16 = vperm.slane %v3836_v10, 0  ;;  %s4608_s19 = sld [smem:[#allocation53_spill]] }
 0x217   : > { %893 = vrot.lane.b32.xlu2 %v3350_v15, %s2996_s15  ;;  %2505 = vmatpush.msk.msrb.mxu2 %vm1116_vm7, %v1136_v26  ;;  %vm921_vm7 = vmand %vm683_vm10, %vm780_vm5 }
 0x218   : > { %v1079_v0 = vpop.permute.xlu0 %1078  ;;  %v3826_v35 = vpop.permute.xlu1 %1326  ;;  %v3851_v9 = vsel %vm921_vm7, 1, %v4544_v1  ;;  %vm976_vm0 = vcmp.eq.s32.totalorder %v972_v16, 1  ;;  %vm899_vm7 = vcmask 523264  }
 0x219   : > { %v1690_v59 = vpop.permute.xlu2 %1689  ;;  %v1089_v43 = vsel %vm1088_vm14, %v1079_v0, %v3613_v7  ;;  %v996_v0 = vsel %vm995_vm11, %v986_v2, %v3611_v6 }
 0x21a   : > { %2506 = vmatpush.msk.msrb.mxu2 %vm1069_vm12, %v1089_v43  ;;  %v923_v43 = vperm.slane %v3851_v9, 0  ;;  %vm4545_vm12 = vcmp.lt.s32.totalorder %v3534_v49, 7 }
 0x21b   : > { %v3871_v2 = vsel %vm4545_vm12, 1, %v4544_v1 }
 0x21c   : > { %vm927_vm6 = vcmp.eq.s32.totalorder %v923_v43, 1  ;;  %v1676_v43 = vperm.slane %v3871_v2, 0 }
 0x21e   : > { %1460 = vrot.lane.b32.xlu0 %v3350_v15, %s2997_s1  ;;  %897 = vrot.lane.b32.xlu1 %v3416_v19, %s2996_s15 }
 0x21f   : > { %1458 = vrot.lane.b32.xlu2 %v3347_v13, %s2997_s1 }
 0x220   : > { %v937_v54 = vpop.permute.xlu0 %936  ;;  %v1032_v5 = vpop.permute.xlu1 %1031 }
 0x221   : > { %v890_v51 = vpop.permute.xlu2 %889  ;;  %v1042_v26 = vsel %vm1041_vm1, %v1032_v5, %v3528_v46 }
 0x222   : > { %2507 = vmatpush.msk.msrb.mxu2 %vm1022_vm9, %v1042_v26  ;;  %vm828_vm9 = vmand %vm683_vm10, %vm685_vm2 }
 0x223   : > { %v3914_v42 = vsel %vm828_vm9, 1, %v4544_v1  ;;  %vm1865_vm9 = vcmp.eq.s32.totalorder %v1861_v4, 1 }
 0x224   : > { %2508 = vmatpush.msk.msrb.mxu2 %vm976_vm0, %v996_v0  ;;  %vm1680_vm0 = vcmp.eq.s32.totalorder %v1676_v43, 1  ;;  %v830_v44 = vperm.slane %v3914_v42, 0 }
 0x226   : > { %1790 = vrot.lane.b32.xlu0 %v3494_v37, %s2994_s11  ;;  %1648 = vrot.lane.b32.xlu1 %v3407_v17, %s2985_s29 }
 0x227   : > { %1788 = vrot.lane.b32.xlu2 %v3416_v19, %s2994_s11  ;;  %s2499_s11 = sshll.u32 %s3103_s23, 4  ;;  %s2297_s23 = scalar_lea.sflag [#allocation6], %s3289_s22 }
 0x228   : > { %v3864_v12 = vpop.permute.xlu0 %1131  ;;  %v3866_v16 = vpop.permute.xlu1 %938 }
 0x229   : > { %v3873_v5 = vpop.permute.xlu2 %1084  ;;  %v3877_v26 = vsel %vm1135_vm3, %v1130_v58, %v3864_v12  ;;  %v947_v0 = vsel %vm4547_vm8, %v937_v54, %v3866_v16 }
 0x22a   : > { %4546 = vst [vmem:[#allocation48_spill] sm:$0xff] %v3877_v26  ;;  %2509 = vmatpush.msk.msrb.mxu2 %vm927_vm6, %v947_v0  ;;  %vm3896_vm6 = vmand %vm683_vm10, %vm684_vm4  ;;  %v3907_v0 = vsel %vm683_vm10, 1, %v4544_v1 }
 0x22b   : > { %vm781_vm12 = vmand %vm3896_vm6, %vm780_vm5  ;;  %v876_v3 = vperm.slane %v3907_v0, 0 }
 0x22c   : > { %v3924_v41 = vsel %vm781_vm12, 1, %v4544_v1  ;;  %vm687_vm10 = vmand %vm3896_vm6, %vm685_vm2 }
 0x22d   : > { %vm880_vm8 = vcmp.eq.s32.totalorder %v876_v3, 1  ;;  %v3954_v3 = vsel %vm687_vm10, 1, %v4544_v1  ;;  %vm4550_vm10 = vcmp.lt.s32.totalorder %v3534_v49, 7 }
 0x22e   : > { %1411 = vrot.lane.b32.xlu0 %v3347_v13, %s2998_s10  ;;  %849 = vrot.lane.b32.xlu1 %v3407_v17, %s2985_s29 }
 0x22f   : > { %851 = vrot.lane.b32.xlu2 %v3416_v19, %s2985_s29 }
 0x230   : > { %v3900_v13 = vpop.permute.xlu0 %1691  ;;  %v3902_v54 = vpop.permute.xlu1 %1133 }
 0x231   : > { %v3909_v26 = vpop.permute.xlu2 %1646  ;;  %v1699_v43 = vsel %vm899_vm7, %v1690_v59, %v3900_v13  ;;  %v3939_v59 = vsel %vm3896_vm6, 1, %v4544_v1  ;;  %vm853_vm6 = vcmask 531456  }
 0x232   : > { %2519 = vmatpush.msk.msrb.mxu3 %vm1680_vm0, %v1699_v43  ;;  %vm834_vm0 = vcmp.eq.s32.totalorder %v830_v44, 1  ;;  %v735_v58 = vperm.slane %v3939_v59, 0  ;;  %v854_v57 = vsel %vm853_vm6, %v3777_v36, %v3438_v21  ;;  %v1355_v44 = vperm.slane %v3511_v40, 3 }
 0x236   : > { %1741 = vrot.lane.b32.xlu0 %v3416_v19, %s2995_s0  ;;  %1413 = vrot.lane.b32.xlu1 %v3350_v15, %s2998_s10  ;;  %v783_v15 = vperm.slane %v3924_v41, 0 }
 0x237   : > { %1602 = vrot.lane.b32.xlu2 %v3407_v17, %s2982_s6 }
 0x238   : > { %v3941_v43 = vpop.permute.xlu0 %891  ;;  %v3943_v29 = vpop.permute.xlu1 %1877  ;;  %vm787_vm12 = vcmp.eq.s32.totalorder %v783_v15, 1 }
 0x239   : > { %v3946_v20 = vpop.permute.xlu2 %1037  ;;  %v1884_v39 = vsel %vm1088_vm14, %v3473_v30, %v3943_v29  ;;  %v900_v4 = vsel %vm899_vm7, %v890_v51, %v3941_v43  ;;  %v689_v30 = vperm.slane %v3954_v3, 0 }
 0x23a   : > { %2510 = vmatpush.msk.msrb.mxu2 %vm880_vm8, %v900_v4  ;;  %2541 = vmatpush.msk.msra.mxu1 %vm1865_vm9, %v1884_v39  ;;  %vm1629_vm8 = vmand %vm4550_vm10, %vm685_vm2  ;;  %vm4551_vm9 = vcmask 580608   ;;  %vm4552_vm10 = vcmask 588800  }
 0x23b   : > { %v807_v39 = vsel %vm4551_vm9, %v3704_v25, %v3454_v23  ;;  %v759_v51 = vsel %vm4552_vm10, %v3775_v62, %v3487_v34  ;;  %vm693_vm15 = vcmp.eq.s32.totalorder %v689_v30, 1  ;;  %v3981_v4 = vsel %vm1629_vm8, 1, %v4544_v1 }
 0x23c   : > { %2511 = vmatpush.msk.msrb.mxu2 %vm834_vm0, %v854_v57  ;;  %vm739_vm0 = vcmp.eq.s32.totalorder %v735_v58, 1  ;;  %v1308_v57 = vperm.slane %v3526_v45, 3  ;;  %vm4553_vm9 = vcmask 596992   ;;  %v1254_v58 = vperm.slane %v3670_v48, 3 }
 0x23d   : > { %v713_v62 = vsel %vm4553_vm9, %v3755_v47, %v3456_v24  ;;  %v1631_v30 = vperm.slane %v3981_v4, 0  ;;  %vm4554_vm8 = vcmask 1039360   ;;  %vm4555_vm9 = vcmp.lt.s32.totalorder %v3534_v49, 7 }
 0x23e   : > { %1695 = vrot.lane.b32.xlu0 %v3416_v19, %s2996_s15  ;;  %1743 = vrot.lane.b32.xlu1 %v3494_v37, %s2995_s0  ;;  %vm1312_vm10 = vcmp.eq.s32.totalorder %v1308_v57, 1  ;;  %v1139_v49 = vsel %vm1135_vm3, %v3864_v12, %v3902_v54 }
 0x23f   : > { %1556 = vrot.lane.b32.xlu2 %v3407_v17, %s2984_s25  ;;  %2512 = vmatpush.msk.msrb.mxu2 %vm787_vm12, %v807_v39  ;;  %vm1359_vm12 = vcmp.eq.s32.totalorder %v1355_v44, 1  ;;  %v1332_v39 = vsel %vm4554_vm8, %v3702_v11, %v3826_v35  ;;  %v1208_v44 = vperm.slane %v3677_v63, 3 }
 0x240   : > { %v1087_v36 = vpop.permute.xlu0 %1086  ;;  %v1083_v15 = vpop.permute.xlu1 %1082 }
 0x241   : > { %v3983_v40 = vpop.permute.xlu2 %1600  ;;  %2513 = vmatpush.msk.msrb.mxu2 %vm739_vm0, %v759_v51  ;;  %v1090_v25 = vsel %vm1088_vm14, %v3613_v7, %v1083_v15  ;;  %v3989_v28 = vsel %vm1088_vm14, %v1083_v15, %v3873_v5  ;;  %v1815_v7 = vperm.slane %v3584_v60, 1  ;;  %v1115_v15 = vperm.slane %v3780_v27, 3 }
 0x242   : > { %2532 = vmatpush.msk.msra.mxu0 %vm1070_vm13, %v1090_v25  ;;  %vm1258_vm13 = vcmp.eq.s32.totalorder %v1254_v58, 1  ;;  %v1021_v58 = vperm.slane %v3831_v56, 3 }
 0x243   : > { %2514 = vmatpush.msk.msrb.mxu2 %vm693_vm15, %v713_v62  ;;  %vm1635_vm15 = vcmp.eq.s32.totalorder %v1631_v30, 1  ;;  %vm1819_vm0 = vcmp.eq.s32.totalorder %v1815_v7, 1  ;;  %v1019_v62 = vperm.slane %v3831_v56, 1  ;;  %v1092_v30 = vsel %vm1088_vm14, %v3873_v5, %v1087_v36 }
 0x245   : > { %2578 = vmatpush.msk.msra.mxu2 %vm1359_vm12, %v3747_v38  ;;  %v1161_v38 = vperm.slane %v3688_v22, 3  ;;  %vm1212_vm12 = vcmp.eq.s32.totalorder %v1208_v44, 1 }
 0x246   : > { %1650 = vrot.lane.b32.xlu0 %v3416_v19, %s2985_s29  ;;  %1697 = vrot.lane.b32.xlu1 %v3494_v37, %s2996_s15 }
 0x247   : > { %2579 = vmatpush.msk.msra.mxu2 %vm1312_vm10, %v1332_v39  ;;  %1511 = vrot.lane.b32.xlu2 %v3407_v17, %s2983_s16  ;;  %vm4025_vm10 = vmand %vm4555_vm9, %vm684_vm4  ;;  %vm1165_vm8 = vcmp.eq.s32.totalorder %v1161_v38, 1  ;;  %v1770_v38 = vperm.slane %v3616_v8, 1 }
 0x248   : > { %v4010_v47 = vpop.permute.xlu0 %1831  ;;  %v1645_v11 = vpop.permute.xlu1 %1644 }
 0x249   : > { %2141 = vmatpush.msra.mxu2 %v3416_v19  ;;  %v4012_v35 = vpop.permute.xlu2 %991  ;;  %v1838_v57 = vsel %vm1041_vm1, %v3543_v50, %v4010_v47  ;;  %v1654_v51 = vsel %vm853_vm6, %v1645_v11, %v3909_v26  ;;  %v1068_v50 = vperm.slane %v3805_v55, 3  ;;  %vm1774_vm9 = vcmp.eq.s32.totalorder %v1770_v38, 1 }
 0x24a   : > { %2520 = vmatpush.msk.msrb.mxu3 %vm1635_vm15, %v1654_v51  ;;  %2542 = vmatpush.msk.msra.mxu1 %vm1819_vm0, %v1838_v57  ;;  %vm1583_vm15 = vmand %vm4025_vm10, %vm780_vm5  ;;  %vm1023_vm0 = vcmp.eq.s32.totalorder %v1019_v62, 1  ;;  %v973_v57 = vperm.slane %v3836_v10, 1  ;;  %v975_v51 = vperm.slane %v3836_v10, 3 }
 0x24b   : > { %2580 = vmatpush.msk.msra.mxu2 %vm1258_vm13, %v3744_v53  ;;  %vm1119_vm13 = vcmp.eq.s32.totalorder %v1115_v15, 1  ;;  %vm1072_vm4 = vcmp.eq.s32.totalorder %v1068_v50, 1  ;;  %v4090_v50 = vsel %vm4025_vm10, 1, %v4544_v1 }
 0x24d   : > { %2581 = vmatpush.msk.msra.mxu2 %vm1212_vm12, %v3762_v61  ;;  %vm1025_vm12 = vcmp.eq.s32.totalorder %v1021_v58, 1 }
 0x24e   : > { %1604 = vrot.lane.b32.xlu0 %v3416_v19, %s2982_s6  ;;  %1652 = vrot.lane.b32.xlu1 %v3494_v37, %s2985_s29 }
 0x24f   : > { %2582 = vmatpush.msk.msra.mxu2 %vm1165_vm8, %v3740_v18  ;;  %1462 = vrot.lane.b32.xlu2 %v3407_v17, %s2997_s1  ;;  %v4048_v18 = vsel %vm1583_vm15, 1, %v4544_v1  ;;  %vm4558_vm8 = vcmask 580608   ;;  %vm979_vm15 = vcmp.eq.s32.totalorder %v975_v51, 1 }
 0x250   : > { %v1040_v53 = vpop.permute.xlu0 %1039  ;;  %v1036_v61 = vpop.permute.xlu1 %1035  ;;  %v1585_v44 = vperm.slane %v4048_v18, 0 }
 0x251   : > { %2583 = vmatpush.msk.msra.mxu2 %vm1119_vm13, %v1139_v49  ;;  %v4052_v7 = vpop.permute.xlu2 %1554  ;;  %v1045_v12 = vsel %vm1041_vm1, %v3946_v20, %v1040_v53  ;;  %v1043_v54 = vsel %vm1041_vm1, %v3528_v46, %v1036_v61  ;;  %v4060_v39 = vsel %vm1041_vm1, %v1036_v61, %v3946_v20  ;;  %vm977_vm13 = vcmp.eq.s32.totalorder %v973_v57, 1 }
 0x252   : > { %2533 = vmatpush.msk.msra.mxu0 %vm1023_vm0, %v1043_v54  ;;  %vm1589_vm3 = vcmp.eq.s32.totalorder %v1585_v44, 1  ;;  %v1539_v61 = vperm.slane %v4090_v50, 0 }
 0x253   : > { %2584 = vmatpush.msk.msra.mxu2 %vm1072_vm4, %v1092_v30  ;;  %v1723_v30 = vperm.slane %v3646_v33, 1 }
 0x254   : > { %vm1543_vm4 = vcmp.eq.s32.totalorder %v1539_v61, 1  ;;  %v926_v61 = vperm.slane %v3851_v9, 3 }
 0x255   : > { %2585 = vmatpush.msk.msra.mxu2 %vm1025_vm12, %v1045_v12  ;;  %v1677_v12 = vperm.slane %v3871_v2, 1  ;;  %vm1727_vm0 = vcmp.eq.s32.totalorder %v1723_v30, 1  ;;  %vm4559_vm12 = vcmask 515072   ;;  %v4563_v30 = vld [vmem:[#allocation30_spill] sm:$0xff] }
 0x256   : > { %1558 = vrot.lane.b32.xlu0 %v3416_v19, %s2984_s25  ;;  %1606 = vrot.lane.b32.xlu1 %v3494_v37, %s2982_s6 }
 0x257   : > { %1415 = vrot.lane.b32.xlu2 %v3407_v17, %s2998_s10 }
 0x258   : > { %v4070_v20 = vpop.permute.xlu0 %1786  ;;  %v1599_v46 = vpop.permute.xlu1 %1598 }
 0x259   : > { %v4072_v5 = vpop.permute.xlu2 %1881  ;;  %v1793_v36 = vsel %vm995_vm11, %v3631_v14, %v4070_v20  ;;  %v1608_v11 = vsel %vm4558_vm8, %v1599_v46, %v3983_v40  ;;  %v2180_v46 = vld [vmem:[%s4561_s13] sm:$0xf] }
 0x25a   : > { %2521 = vmatpush.msk.msrb.mxu3 %vm1589_vm3, %v1608_v11  ;;  %2543 = vmatpush.msk.msra.mxu1 %vm1774_vm9, %v1793_v36  ;;  %vm4560_vm3 = vcmask 588800   ;;  %vm1681_vm9 = vcmp.eq.s32.totalorder %v1677_v12, 1  ;;  %v924_v36 = vperm.slane %v3851_v9, 1  ;;  %v877_v11 = vperm.slane %v3907_v0, 1 }
 0x25c   : > { %vm928_vm8 = vcmp.eq.s32.totalorder %v924_v36, 1 }
 0x25e   : > { %1515 = vrot.lane.b32.xlu0 %v3494_v37, %s2983_s16  ;;  %1560 = vrot.lane.b32.xlu1 %v3494_v37, %s2984_s25 }
 0x25f   : > { %1513 = vrot.lane.b32.xlu2 %v3416_v19, %s2983_s16  ;;  %s4575_s16 = sld [smem:[#allocation51_spill]] }
 0x260   : > { %v994_v14 = vpop.permute.xlu0 %993  ;;  %v990_v15 = vpop.permute.xlu1 %989 }
 0x261   : > { %v945_v62 = vpop.permute.xlu2 %944  ;;  %v999_v58 = vsel %vm995_vm11, %v4012_v35, %v994_v14  ;;  %v997_v49 = vsel %vm995_vm11, %v3611_v6, %v990_v15  ;;  %v4098_v53 = vsel %vm995_vm11, %v990_v15, %v4012_v35 }
 0x262   : > { %2534 = vmatpush.msk.msra.mxu0 %vm977_vm13, %v997_v49  ;;  %2586 = vmatpush.msk.msra.mxu2 %vm979_vm15, %v999_v58  ;;  %vm4562_vm13 = vmmov %vm4559_vm12  ;;  %vm881_vm15 = vcmp.eq.s32.totalorder %v877_v11, 1  ;;  %v784_v58 = vperm.slane %v3924_v41, 1  ;;  %v736_v49 = vperm.slane %v3939_v59, 1 }
 0x265   : > { %s4576_s25 = smov %s4575_s16 }
 0x266   : > { %1417 = vrot.lane.b32.xlu0 %v3416_v19, %s2998_s10  ;;  %1464 = vrot.lane.b32.xlu1 %v3416_v19, %s2997_s1 }
 0x267   : > { %1466 = vrot.lane.b32.xlu2 %v3494_v37, %s2997_s1  ;;  %s4614_s1 = sld [smem:[#allocation55_spill]] }
 0x268   : > { %v4109_v6 = vpop.permute.xlu0 %1739  ;;  %v1553_v35 = vpop.permute.xlu1 %1552 }
 0x269   : > { %v4111_v54 = vpop.permute.xlu2 %1693  ;;  %v1746_v44 = vsel %vm4559_vm12, %v3547_v52, %v4109_v6  ;;  %v1562_v38 = vsel %vm4560_vm3, %v1553_v35, %v4052_v7  ;;  %v831_v52 = vperm.slane %v3914_v42, 1  ;;  %vm1492_vm12 = vmand %vm4025_vm10, %vm685_vm2  ;;  %v4565_v35 = vld [vmem:[#allocation33_spill] sm:$0xff]  ;;  %vm4566_vm3 = vcmask 580608  }
 0x26a   : > { %2522 = vmatpush.msk.msrb.mxu3 %vm1543_vm4, %v1562_v38  ;;  %2544 = vmatpush.msk.msra.mxu1 %vm1727_vm0, %v1746_v44  ;;  %v1700_v19 = vsel %vm899_vm7, %v3900_v13, %v4111_v54  ;;  %vm788_vm0 = vcmp.eq.s32.totalorder %v784_v58, 1  ;;  %v808_v44 = vsel %vm4566_vm3, %v3454_v23, %v4565_v35  ;;  %vm4569_vm2 = vcmask 515072   ;;  %v4571_v23 = vld [vmem:[#allocation31_spill] sm:$0xff] }
 0x26b   : > { %vm835_vm4 = vcmp.eq.s32.totalorder %v831_v52, 1  ;;  %vm4570_vm10 = vmmov %vm4569_vm2  ;;  %v879_v35 = vperm.slane %v3907_v0, 3 }
 0x26c   : > { %2545 = vmatpush.msk.msra.mxu1 %vm1681_vm9, %v1700_v19  ;;  %vm740_vm9 = vcmp.eq.s32.totalorder %v736_v49, 1  ;;  %v4156_v19 = vsel %vm1492_vm12, 1, %v4544_v1 }
 0x26d   : > { %v1494_v58 = vperm.slane %v4156_v19, 0  ;;  %s2873_s29 = scalar_lea.hbm %s4614_s1, 32 }
 0x26e   : > { %2183 = vperm.xlu0 %2731, %v2180_v46   ;;  %1419 = vrot.lane.b32.xlu1 %v3494_v37, %s2998_s10  ;;  %v4567_v46 = vld [vmem:[#allocation29_spill] sm:$0xff]  ;;  %s2308_s10 = scalar_lea.hbm %s4614_s1, %s2499_s11 }
 0x26f   : > { %vm1498_vm12 = vcmp.eq.s32.totalorder %v1494_v58, 1  ;;  %v1586_v58 = vperm.slane %v4048_v18, 1  ;;  %s2312_s13 = sshll.u32 %s2308_s10, 4  ;;  %s2313_s13 = int_to_ptr.hbm [resolvable:$true] %s2312_s13 }
 0x270   : > { %v941_v57 = vpop.permute.xlu0 %940  ;;  %v1880_v51 = vpop.permute.xlu1 %1879  ;;  %s2867_s7 = sshra.s32 %s2313_s13, 4  ;;  %s2868_s7 = int_to_ptr.hbm [resolvable:$true] %s2867_s7 }
 0x271   : > { %v4129_v14 = vpop.permute.xlu2 %893  ;;  %v948_v13 = vsel %vm4562_vm13, %v3866_v16, %v941_v57  ;;  %v4135_v15 = vsel %vm1088_vm14, %v3943_v29, %v1880_v51  ;;  %v855_v16 = vsel %vm853_vm6, %v3438_v21, %v4563_v30  ;;  %v690_v29 = vperm.slane %v3954_v3, 1  ;;  %s2869_s24 = scalar_lea.hbm %s2868_s7, 16  ;;  %p2874_p5 = scmp.lt.s32.totalorder %s2868_s7, %s4614_s1 }
 0x272   : > { %2535 = vmatpush.msk.msra.mxu0 %vm928_vm8, %v948_v13  ;;  %v901_v37 = vsel %vm899_vm7, %v3941_v43, %v4129_v14  ;;  %v4564_v43 = vld [vmem:[#allocation36_spill] sm:$0xff]  ;;  %vm930_vm8 = vcmp.eq.s32.totalorder %v926_v61, 1  ;;  %vm4568_vm13 = vcmask 588800   ;;  %v1817_v61 = vperm.slane %v3584_v60, 3  ;;  %p2870_p7 = scmp.ne.s32.totalorder %s2868_s7, %s2869_s24  ;;  %p2875_p0 = scmp.lt.s32.totalorder %s2873_s29, %s2869_s24 }
 0x273   : > { %v1863_v12 = vperm.slane %v4564_v43, 3  ;;  %v760_v25 = vsel %vm4568_vm13, %v3487_v34, %v4567_v46 }
 0x274   : > { %2536 = vmatpush.msk.msra.mxu0 %vm881_vm15, %v901_v37  ;;  %vm694_vm15 = vcmp.eq.s32.totalorder %v690_v29, 1  ;;  %v1886_v37 = vsel %vm1088_vm14, %v1880_v51, %v4072_v5  ;;  %vm1821_vm13 = vcmp.eq.s32.totalorder %v1817_v61, 1  ;;  %p2871_p9 = pnand %p2870_p7, %p4617_p6  ;;  %p2876_p10 = por %p2875_p0, %p2874_p5 }
 0x276   : > { %2537 = vmatpush.msk.msra.mxu0 %vm835_vm4, %v855_v16  ;;  %vm1867_vm4 = vcmp.eq.s32.totalorder %v1863_v12, 1  ;;  %v4191_v12 = vld [vmem:[%s4575_s16] sm:$0xff]  ;;  %p2872_p8 = pneg %p2871_p9 }
 0x277   : > { %2035 = vmatmul.f32.vlgmr.msrb.gmra.mxu2 %v4191_v12 }
 0x278   : > { %v1508_v38 = vpop.permute.xlu0 %1507  ;;  %2538 = vmatpush.msk.msra.mxu0 %vm788_vm0, %v808_v44  ;;  %v943_v21 = vpop.permute.xlu1 %942  ;;  %vm4572_vm0 = vcmask 596992   ;;  %p2877_p4 = pnand %p2876_p10, %p2872_p8 }
 0x279   : > { %v1459_v36 = vpop.permute.xlu2 %1458  ;;  %v4162_v11 = vsel %vm4569_vm2, %v941_v57, %v943_v21  ;;  %v950_v52 = vsel %vm4570_vm10, %v943_v21, %v945_v62  ;;  %v714_v13 = vsel %vm4572_vm0, %v3456_v24, %v4571_v23  ;;  %vm4573_vm3 = vmmov %vm4572_vm0  ;;  %vm883_vm2 = vcmp.eq.s32.totalorder %v879_v35, 1 }
 0x27a   : > { %2539 = vmatpush.msk.msra.mxu0 %vm740_vm9, %v760_v25  ;;  %2587 = vmatpush.msk.msra.mxu2 %vm930_vm8, %v950_v52  ;;  %vm4574_vm9 = vcmp.lt.s32.totalorder %v3482_v31, 7  ;;  %v1632_v23 = vperm.slane %v3981_v4, 1  ;;  %vm4577_vm0 = vcmask 580608   ;;  %v833_v35 = vperm.slane %v3914_v42, 3 }
 0x27b   : > { %vm1443_vm8 = vmand %vm4574_vm9, %vm780_vm5  ;;  %vm1468_vm5 = vcmask 973824  }
 0x27c   : > { %2540 = vmatpush.msk.msra.mxu0 %vm694_vm15, %v714_v13  ;;  %v4184_v51 = vsel %vm1443_vm8, 1, %v4544_v1  ;;  %v1772_v13 = vperm.slane %v3616_v8, 3  ;;  %vm1636_vm10 = vcmp.eq.s32.totalorder %v1632_v23, 1  ;;  %vm837_vm9 = vcmp.eq.s32.totalorder %v833_v35, 1  ;;  %v4583_v35 = vld [vmem:[#allocation44_spill] sm:$0xff] }
 0x27d   : > { %v1445_v32 = vperm.slane %v4184_v51, 0  ;;  %2075 = vmatmul.f32.vlgmr.msra.gmra.mxu0 %v4191_v12 }
 0x27e   : > { %2593 = vmatpush.msk.msrb.mxu0 %vm1867_vm4, %v1886_v37  ;;  %vm1776_vm15 = vcmp.eq.s32.totalorder %v1772_v13, 1  ;;  %v1540_v37 = vperm.slane %v4090_v50, 1  ;;  %vm1590_vm4 = vcmp.eq.s32.totalorder %v1586_v58, 1 }
 0x27f   : > { %vm1449_vm14 = vcmp.eq.s32.totalorder %v1445_v32, 1 }
 0x280   : > { %v4171_v34 = vpop.permute.xlu0 %1833  ;;  %v1510_v57 = vpop.permute.xlu1 %1509 }
 0x281   : > { %v4173_v62 = vpop.permute.xlu2 %1788  ;;  %v1517_v49 = vsel %vm4573_vm3, %v1508_v38, %v1510_v57  ;;  %vm4578_vm3 = vcmask 588800  }
 0x282   : > { %2523 = vmatpush.msk.msrb.mxu3 %vm1498_vm12, %v1517_v49  ;;  %vm1544_vm12 = vcmp.eq.s32.totalorder %v1540_v37, 1  ;;  %v692_v37 = vperm.slane %v3954_v3, 3 }
 0x288   : > { %v4181_v24 = vpop.permute.xlu0 %895  ;;  %v1836_v5 = vpop.permute.xlu1 %1835 }
 0x289   : > { %v852_v16 = vpop.permute.xlu2 %851  ;;  %v1840_v29 = vsel %vm1041_vm1, %v4171_v34, %v1836_v5 }
 0x28a   : > { %2594 = vmatpush.msk.msrb.mxu0 %vm1821_vm13, %v1840_v29  ;;  %vm4579_vm13 = vcmp.lt.s32.totalorder %v3482_v31, 7  ;;  %v1446_v31 = vperm.slane %v4184_v51, 1 }
 0x290   : > { %v4197_v44 = vpop.permute.xlu0 %1460  ;;  %v898_v38 = vpop.permute.xlu1 %897 }
 0x291   : > { %v4199_v21 = vpop.permute.xlu2 %1602  ;;  %v903_v25 = vsel %vm899_vm7, %v4181_v24, %v898_v38  ;;  %v1469_v52 = vsel %vm1468_vm5, %v1459_v36, %v4197_v44  ;;  %v1495_v38 = vperm.slane %v4156_v19, 1 }
 0x292   : > { %2524 = vmatpush.msk.msrb.mxu3 %vm1449_vm14, %v1469_v52  ;;  %2588 = vmatpush.msk.msra.mxu2 %vm883_vm2, %v903_v25  ;;  %v1609_v32 = vsel %vm4577_vm0, %v3983_v40, %v4199_v21  ;;  %v786_v52 = vperm.slane %v3924_v41, 3  ;;  %v4233_v40 = vsel %vm4579_vm13, 1, %v4544_v1  ;;  %vm4580_vm2 = vcmask 596992   ;;  %v4582_v1 = vld [vmem:[#allocation34_spill] sm:$0xff] }
 0x293   : > { %vm1499_vm8 = vcmp.eq.s32.totalorder %v1495_v38, 1 }
 0x294   : > { %vm790_vm14 = vcmp.eq.s32.totalorder %v786_v52, 1  ;;  %v4254_v52 = vld [vmem:[%s4576_s25 + $0x8] sm:$0xff] }
 0x298   : > { %v1791_v49 = vpop.permute.xlu0 %1790  ;;  %v4209_v61 = vpop.permute.xlu1 %1648 }
 0x299   : > { %v4211_v5 = vpop.permute.xlu2 %1556  ;;  %v1795_v36 = vsel %vm995_vm11, %v4173_v62, %v1791_v49  ;;  %v1655_v29 = vsel %vm853_vm6, %v3909_v26, %v4209_v61  ;;  %v738_v26 = vperm.slane %v3939_v59, 3 }
 0x29a   : > { %2546 = vmatpush.msk.msra.mxu1 %vm1636_vm10, %v1655_v29  ;;  %2595 = vmatpush.msk.msrb.mxu0 %vm1776_vm15, %v1795_v36  ;;  %v1563_v25 = vsel %vm4578_vm3, %v4052_v7, %v4211_v5  ;;  %v1398_v36 = vperm.slane %v4233_v40, 0  ;;  %v4581_v29 = vld [vmem:[#allocation41_spill] sm:$0xff]  ;;  %vm696_vm15 = vcmp.eq.s32.totalorder %v692_v37, 1  ;;  %vm2015_vm3 = vcmask 719872  }
 0x29b   : > { %vm742_vm10 = vcmp.eq.s32.totalorder %v738_v26, 1  ;;  %v1253_v37 = vperm.slane %v3670_v48, 2 }
 0x29c   : > { %2547 = vmatpush.msk.msra.mxu1 %vm1590_vm4, %v1609_v32  ;;  %v1354_v32 = vperm.slane %v4582_v1, 2  ;;  %vm1421_vm4 = vcmask 982016   ;;  %vm1402_vm0 = vcmp.eq.s32.totalorder %v1398_v36, 1  ;;  %v4585_v36 = vld [vmem:[#allocation46_spill] sm:$0xff]  ;;  %v1160_v1 = vperm.slane %v3688_v22, 2  ;;  %v2009_v22 = vld [vmem:[%s4591_s26] sm:$0xff] }
 0x29d   : > { %vm1257_vm13 = vcmp.eq.s32.totalorder %v1253_v37, 1  ;;  %v4592_v37 = vld [vmem:[#allocation47_spill] sm:$0xff]  ;;  %2012 = vperm.xlu2 %2732, %v2009_v22  }
 0x29e   : > { %2548 = vmatpush.msk.msra.mxu1 %vm1544_vm12, %v1563_v25  ;;  %vm1450_vm12 = vcmp.eq.s32.totalorder %v1446_v31, 1  ;;  %v4586_v31 = vld [vmem:[#allocation43_spill] sm:$0xff] }
 0x2a0   : > { %v1412_v23 = vpop.permute.xlu0 %1411  ;;  %v4228_v13 = vpop.permute.xlu1 %849 }
 0x2a1   : > { %v4235_v58 = vpop.permute.xlu2 %1511  ;;  %v857_v7 = vsel %vm853_vm6, %v4228_v13, %v852_v16  ;;  %v1307_v16 = vperm.slane %v3526_v45, 2 }
 0x2a2   : > { %v1518_v49 = vsel %vm4580_vm2, %v1510_v57, %v4235_v58  ;;  %2589 = vmatpush.msk.msra.mxu2 %vm837_vm9, %v857_v7  ;;  %v4584_v57 = vld [vmem:[#allocation38_spill] sm:$0xff]  ;;  %vm1358_vm9 = vcmp.eq.s32.totalorder %v1354_v32, 1 }
 0x2a3   : > { %2549 = vmatpush.msk.msra.mxu1 %vm1499_vm8, %v1518_v49  ;;  %vm1311_vm8 = vcmp.eq.s32.totalorder %v1307_v16, 1  ;;  %v1725_v49 = vperm.slane %v3646_v33, 3  ;;  %v4587_v16 = vld [vmem:[#allocation45_spill] sm:$0xff] }
 0x2a4   : > { %2590 = vmatpush.msk.msra.mxu2 %vm790_vm14, %v4581_v29  ;;  %v1207_v29 = vperm.slane %v3677_v63, 2 }
 0x2a5   : > { %vm1729_vm14 = vcmp.eq.s32.totalorder %v1725_v49, 1  ;;  %v4593_v49 = vld [vmem:[#allocation35_spill] sm:$0xff] }
 0x2a6   : > { %2591 = vmatpush.msk.msra.mxu2 %vm742_vm10, %v4583_v35  ;;  %v1816_v35 = vperm.slane %v3584_v60, 2  ;;  %vm4589_vm10 = vcmask 7168   ;;  %v1771_v60 = vperm.slane %v3616_v8, 2  ;;  %v1724_v8 = vperm.slane %v3646_v33, 2 }
 0x2a7   : > { %v974_v33 = vperm.slane %v3836_v10, 2 }
 0x2a8   : > { %v4248_v38 = vpop.permute.xlu0 %1741  ;;  %2592 = vmatpush.msk.msra.mxu2 %vm696_vm15, %v4584_v57  ;;  %v1414_v25 = vpop.permute.xlu1 %1413  ;;  %v4588_v57 = vld [vmem:[#allocation32_spill] sm:$0xff]  ;;  %vm4590_vm15 = vcmask 515072  }
 0x2a9   : > { %v4256_v26 = vpop.permute.xlu2 %1462  ;;  %v1422_v7 = vsel %vm1421_vm4, %v1412_v23, %v1414_v25  ;;  %2155 = vmatmul.f32.vlgmr.msra.gmra.mxu2 %v4191_v12  ;;  %v1399_v23 = vperm.slane %v4233_v40, 1 }
 0x2aa   : > { %v1470_v45 = vsel %vm1468_vm5, %v4197_v44, %v4256_v26  ;;  %2525 = vmatpush.msk.msrb.mxu3 %vm1402_vm0, %v1422_v7  ;;  %v1862_v44 = vperm.slane %v4564_v43, 2  ;;  %v1277_v7 = vsel %vm4589_vm10, %v4588_v57, %v4587_v16  ;;  %vm1211_vm0 = vcmp.eq.s32.totalorder %v1207_v29, 1  ;;  %v4604_v16 = vld [vmem:[#allocation37_spill] sm:$0xff] }
 0x2ab   : > { %2550 = vmatpush.msk.msra.mxu1 %vm1450_vm12, %v1470_v45  ;;  %2484 = vmatmul.msk.f32.vlgmr.msrb.gmra.mxu3 %vm2015_vm3, %v4254_v52  ;;  %vm1403_vm2 = vcmp.eq.s32.totalorder %v1399_v23, 1  ;;  %v1114_v45 = vperm.slane %v3780_v27, 2  ;;  %v1067_v27 = vperm.slane %v3805_v55, 2  ;;  %v1020_v23 = vperm.slane %v3831_v56, 2  ;;  %v4595_v55 = vld [vmem:[#allocation42_spill] sm:$0xff] }
 0x2ac   : > { %2552 = vmatpush.msk.msra.mxu3 %vm1358_vm9, %v4585_v36  ;;  %vm1866_vm12 = vcmp.eq.s32.totalorder %v1862_v44, 1  ;;  %vm4594_vm9 = vcmask 56320   ;;  %v1839_v29 = vsel %vm1041_vm1, %v4010_v47, %v4171_v34  ;;  %v4596_v44 = vld [vmem:[#allocation48_spill] sm:$0xff]  ;;  %v1633_v47 = vperm.slane %v3981_v4, 2 }
 0x2ad   : > { %v1231_v36 = vsel %vm4594_vm9, %v4593_v49, %v4592_v37  ;;  %vm1071_vm10 = vcmp.eq.s32.totalorder %v1067_v27, 1  ;;  %vm1024_vm1 = vcmp.eq.s32.totalorder %v1020_v23, 1  ;;  %vm978_vm9 = vcmp.eq.s32.totalorder %v974_v33, 1 }
 0x2ae   : > { %2553 = vmatpush.msk.msra.mxu3 %vm1311_vm8, %v4586_v31  ;;  %vm1164_vm8 = vcmp.eq.s32.totalorder %v1160_v1, 1  ;;  %v1678_v31 = vperm.slane %v3871_v2, 2 }
 0x2b0   : > { %2101 = vmatpush.msra.mxu3 %v3407_v17  ;;  %v1696_v32 = vpop.permute.xlu0 %1695  ;;  %v1744_v48 = vpop.permute.xlu1 %1743 }
 0x2b1   : > { %v4278_v63 = vpop.permute.xlu2 %1415  ;;  %v1748_v43 = vsel %vm4590_vm15, %v4248_v38, %v1744_v48  ;;  %vm1728_vm15 = vcmp.eq.s32.totalorder %v1724_v8, 1  ;;  %v1701_v48 = vsel %vm899_vm7, %v4111_v54, %v1696_v32 }
 0x2b2   : > { %v1423_v17 = vsel %vm1421_vm4, %v1414_v25, %v4278_v63  ;;  %2554 = vmatpush.msk.msra.mxu3 %vm1257_vm13, %v1277_v7  ;;  %2596 = vmatpush.msk.msrb.mxu0 %vm1729_vm14, %v1748_v43  ;;  %vm1820_vm13 = vcmp.eq.s32.totalorder %v1816_v35, 1  ;;  %v1679_v25 = vperm.slane %v3871_v2, 3  ;;  %vm1118_vm14 = vcmp.eq.s32.totalorder %v1114_v45, 1 }
 0x2b3   : > { %2551 = vmatpush.msk.msra.mxu1 %vm1403_vm2, %v1423_v17  ;;  %vm1775_vm2 = vcmp.eq.s32.totalorder %v1771_v60, 1  ;;  %v925_v2 = vperm.slane %v3851_v9, 2  ;;  %v1634_v9 = vperm.slane %v3981_v4, 3  ;;  %v902_v4 = vsel %vm899_vm7, %v4129_v14, %v4181_v24 }
 0x2b4   : > { %2485 = vmatmul.msk.f32.vlgmr.msra.gmra.mxu1 %vm2015_vm3, %v4254_v52  ;;  %2555 = vmatpush.msk.msra.mxu3 %vm1211_vm0, %v1231_v36  ;;  %vm1683_vm0 = vcmp.eq.s32.totalorder %v1679_v25, 1  ;;  %v1541_v14 = vperm.slane %v4090_v50, 2  ;;  %v1588_v24 = vperm.slane %v4048_v18, 3  ;;  %v1497_v7 = vperm.slane %v4156_v19, 3 }
 0x2b5   : > { %2567 = vmatpush.msk.msrb.mxu1 %vm1866_vm12, %v4135_v15  ;;  %v1794_v15 = vsel %vm995_vm11, %v4070_v20, %v4173_v62  ;;  %vm4597_vm12 = vcmask 515072   ;;  %vm1682_vm11 = vcmp.eq.s32.totalorder %v1678_v31, 1  ;;  %v878_v20 = vperm.slane %v3907_v0, 2 }
 0x2b6   : > { %2556 = vmatpush.msk.msra.mxu3 %vm1164_vm8, %v4595_v55  ;;  %v1747_v10 = vsel %vm4597_vm12, %v4109_v6, %v4248_v38  ;;  %v1587_v62 = vperm.slane %v4048_v18, 2  ;;  %vm1637_vm8 = vcmp.eq.s32.totalorder %v1633_v47, 1  ;;  %v785_v0 = vperm.slane %v3924_v41, 2  ;;  %v4600_v38 = vld [vmem:[#allocation40_spill] sm:$0xff] }
 0x2b7   : > { %2568 = vmatpush.msk.msrb.mxu1 %vm1820_vm13, %v1839_v29  ;;  %vm929_vm13 = vcmp.eq.s32.totalorder %v925_v2, 1  ;;  %v856_v41 = vsel %vm853_vm6, %v4563_v30, %v4228_v13  ;;  %vm4601_vm12 = vcmask 588800   ;;  %v1447_v60 = vperm.slane %v4184_v51, 2 }
 0x2b8   : > { %2557 = vmatpush.msk.msra.mxu3 %vm1118_vm14, %v4596_v44  ;;  %v1651_v56 = vpop.permute.xlu0 %1650  ;;  %v1698_v34 = vpop.permute.xlu1 %1697  ;;  %vm882_vm14 = vcmp.eq.s32.totalorder %v878_v20, 1 }
 0x2b9   : > { %2569 = vmatpush.msk.msrb.mxu1 %vm1775_vm2, %v1794_v15  ;;  %v1702_v1 = vsel %vm899_vm7, %v1696_v32, %v1698_v34  ;;  %v1656_v6 = vsel %vm853_vm6, %v4209_v61, %v1651_v56  ;;  %vm1591_vm2 = vcmp.eq.s32.totalorder %v1587_v62, 1  ;;  %v761_v32 = vsel %vm4601_vm12, %v4567_v46, %v4600_v38  ;;  %v1514_v30 = vpop.permute.xlu2 %1513 }
 0x2ba   : > { %2558 = vmatpush.msk.msra.mxu3 %vm1071_vm10, %v3989_v28  ;;  %2597 = vmatpush.msk.msrb.mxu0 %vm1683_vm0, %v1702_v1  ;;  %v832_v28 = vperm.slane %v3914_v42, 2  ;;  %vm1638_vm10 = vcmp.eq.s32.totalorder %v1634_v9, 1  ;;  %v1542_v46 = vperm.slane %v4090_v50, 3  ;;  %v2273_v9 = vld.sshfl [vmem:[#allocation1 + $0x8] sm:$0xff pattern:$0x75316420] }
 0x2bb   : > { %2570 = vmatpush.msk.msrb.mxu1 %vm1728_vm15, %v1747_v10  ;;  %vm4598_vm15 = vcmask 580608  }
 0x2bc   : > { %2559 = vmatpush.msk.msra.mxu3 %vm1024_vm1, %v4060_v39  ;;  %vm836_vm0 = vcmp.eq.s32.totalorder %v832_v28, 1  ;;  %vm789_vm1 = vcmp.eq.s32.totalorder %v785_v0, 1  ;;  %v2272_v0 = vld.sshfl [vmem:[#allocation1] sm:$0xff pattern:$0x75316420] }
 0x2bd   : > { %2571 = vmatpush.msk.msrb.mxu1 %vm1682_vm11, %v1701_v48 }
 0x2be   : > { %2560 = vmatpush.msk.msra.mxu3 %vm978_vm9, %v4098_v53  ;;  %v737_v53 = vperm.slane %v3939_v59, 2  ;;  %v1496_v59 = vperm.slane %v4156_v19, 2  ;;  %vm1592_vm9 = vcmp.eq.s32.totalorder %v1588_v24, 1  ;;  %v2274_v24 = vld.sshfl [vmem:[#allocation1 + $0x10] sm:$0xff pattern:$0x75316420] }
 0x2bf   : > { %2572 = vmatpush.msk.msrb.mxu1 %vm1637_vm8, %v1656_v6  ;;  %vm4602_vm8 = vmmov %vm4601_vm12 }
 0x2c0   : > { %2561 = vmatpush.msk.msra.mxu3 %vm929_vm13, %v4162_v11  ;;  %v1605_v39 = vpop.permute.xlu0 %1604  ;;  %v1653_v54 = vpop.permute.xlu1 %1652  ;;  %v691_v11 = vperm.slane %v3954_v3, 2  ;;  %vm741_vm7 = vcmp.eq.s32.totalorder %v737_v53, 1  ;;  %vm1500_vm13 = vcmp.eq.s32.totalorder %v1496_v59, 1 }
 0x2c1   : > { %v1610_v42 = vsel %vm4598_vm15, %v4199_v21, %v1605_v39  ;;  %v1657_v61 = vsel %vm853_vm6, %v1651_v56, %v1653_v54  ;;  %v4599_v21 = vld [vmem:[#allocation39_spill] sm:$0xff]  ;;  %vm1545_vm6 = vcmp.eq.s32.totalorder %v1541_v14, 1  ;;  %v1467_v22 = vpop.permute.xlu2 %1466 }
 0x2c2   : > { %2562 = vmatpush.msk.msra.mxu3 %vm882_vm14, %v902_v4  ;;  %2573 = vmatpush.msk.msrb.mxu1 %vm1591_vm2, %v1610_v42  ;;  %vm695_vm11 = vcmp.eq.s32.totalorder %v691_v11, 1  ;;  %vm4603_vm14 = vmmov %vm4598_vm15  ;;  %vm4605_vm2 = vcmask 596992  }
 0x2c3   : > { %2598 = vmatpush.msk.msrb.mxu0 %vm1638_vm10, %v1657_v61  ;;  %v1519_v57 = vsel %vm4605_vm2, %v4235_v58, %v1514_v30  ;;  %vm1546_vm10 = vcmp.eq.s32.totalorder %v1542_v46, 1  ;;  %vm4606_vm15 = vmmov %vm4602_vm8  ;;  %v1448_v58 = vperm.slane %v4184_v51, 3  ;;  %v1401_v51 = vperm.slane %v4233_v40, 3 }
 0x2c4   : > { %2563 = vmatpush.msk.msra.mxu3 %vm836_vm0, %v856_v41  ;;  %vm1501_vm0 = vcmp.eq.s32.totalorder %v1497_v7, 1  ;;  %v2275_v41 = vld.sshfl [vmem:[#allocation1 + $0x18] sm:$0xff pattern:$0x75316420] }
 0x2c5   : > { %vm1452_vm12 = vcmp.eq.s32.totalorder %v1448_v58, 1 }
 0x2c6   : > { %2564 = vmatpush.msk.msra.mxu3 %vm789_vm1, %v4599_v21  ;;  %vm4607_vm1 = vmmov %vm4605_vm2 }
 0x2c8   : > { %2565 = vmatpush.msk.msra.mxu3 %vm741_vm7, %v761_v32  ;;  %v1559_v13 = vpop.permute.xlu0 %1558  ;;  %v1607_v35 = vpop.permute.xlu1 %1606  ;;  %vm1451_vm7 = vcmp.eq.s32.totalorder %v1447_v60, 1 }
 0x2c9   : > { %v1564_v3 = vsel %vm4602_vm8, %v4211_v5, %v1559_v13  ;;  %v1611_v18 = vsel %vm4603_vm14, %v1605_v39, %v1607_v35  ;;  %vm4613_vm8 = vcmask 1043456  }
 0x2ca   : > { %2566 = vmatpush.msk.msra.mxu3 %vm695_vm11, %v4604_v16  ;;  %2574 = vmatpush.msk.msrb.mxu1 %vm1545_vm6, %v1564_v3  ;;  %vm1405_vm6 = vcmp.eq.s32.totalorder %v1401_v51, 1 }
 0x2cb   : > { %2599 = vmatpush.msk.msrb.mxu0 %vm1592_vm9, %v1611_v18  ;;  %2115 = vmatmul.f32.vlgmr.msra.gmra.mxu3 %v4191_v12  ;;  %v1400_v12 = vperm.slane %v4233_v40, 2  ;;  %v2179_v40 = vld [vmem:[%s4608_s19] sm:$0xf] }
 0x2cc   : > { %2575 = vmatpush.msk.msrb.mxu1 %vm1500_vm13, %v1519_v57  ;;  %vm4616_vm13 = vmmov %vm4613_vm8 }
 0x2cd   : > { %vm1404_vm11 = vcmp.eq.s32.totalorder %v1400_v12, 1 }
 0x2d0   : > { %v1516_v43 = vpop.permute.xlu0 %1515  ;;  %v1561_v5 = vpop.permute.xlu1 %1560 }
 0x2d1   : > { %v1565_v45 = vsel %vm4606_vm15, %v1559_v13, %v1561_v5  ;;  %v1520_v17 = vsel %vm4607_vm1, %v1514_v30, %v1516_v43 }
 0x2d2   : > { %2600 = vmatpush.msk.msrb.mxu0 %vm1546_vm10, %v1565_v45 }
 0x2d4   : > { %2601 = vmatpush.msk.msrb.mxu0 %vm1501_vm0, %v1520_v17 }
 0x2d8   : > { %v1418_v50 = vpop.permute.xlu0 %1417  ;;  %v1465_v19 = vpop.permute.xlu1 %1464 }
 0x2d9   : > { %v1471_v37 = vsel %vm1468_vm5, %v4256_v26, %v1465_v19  ;;  %v1472_v49 = vsel %vm1468_vm5, %v1465_v19, %v1467_v22  ;;  %v1424_v36 = vsel %vm1421_vm4, %v4278_v63, %v1418_v50  ;;  %vm4609_vm5 = vcmask 64512  }
 0x2da   : > { %2576 = vmatpush.msk.msrb.mxu1 %vm1451_vm7, %v1471_v37  ;;  %2602 = vmatpush.msk.msrb.mxu0 %vm1452_vm12, %v1472_v49 }
 0x2dc   : > { %2577 = vmatpush.msk.msrb.mxu1 %vm1404_vm11, %v1424_v36 }
 0x2dd   : > { %2486 = vmatmul.msk.f32.vlgmr.msrb.gmra.mxu1 %vm2015_vm3, %v4254_v52 }
 0x2e0   : > { %v1420_v27 = vpop.permute.xlu1 %1419  ;;  %v2184_v62 = vpop.permute.xlu0 %2183 }
 0x2e1   : > { %v1425_v8 = vsel %vm1421_vm4, %v1418_v50, %v1420_v27  ;;  %vm4610_vm4 = vmmov %vm4609_vm5 }
 0x2e2   : > { %2603 = vmatpush.msk.msrb.mxu0 %vm1405_vm6, %v1425_v8 }
 0x2e3   : > { %2487 = vmatmul.msk.f32.vlgmr.msrb.gmra.mxu0 %vm2015_vm3, %v4254_v52  ;;  %vm4611_vm3 = vmmov %vm4610_vm4 }
 0x2e4   : > { %vm4612_vm9 = vmmov %vm4611_vm3 }
 0x2f7   : > { %v2013_v26 = vpop.permute.xlu2 %2012 }
 0x2fa   : > { %v2036_v25 = vpop.f32.mrf.mxu2  ;;  %v2076_v29 = vpop.f32.mrf.mxu0 }
 0x2fb   : > { %v2037_v23 = vadd.f32 %v2036_v25, %v2013_v26  ;;  %v2077_v63 = vadd.f32 %v2076_v29, %v2013_v26 }
 0x32c   : > { %v2156_v34 = vpop.f32.mrf.mxu2 }
 0x32d   : > { %v2157_v2 = vadd.f32 %v2156_v34, %v2013_v26 }
 0x32e   : > { %v2056_v55 = vpop.f32.mrf.mxu3 }
 0x32f   : > { %v2057_v31 = vadd.f32 %v2056_v55, %v2037_v23 }
 0x331   : > { %v2096_v33 = vpop.f32.mrf.mxu1  ;;  %2204 = vmatpush.msra.mxu1 %v2057_v31 }
 0x332   : > { %v2097_v15 = vadd.f32 %v2096_v33, %v2077_v63  ;;  %2488 = vmatmul.msk.f32.vlgmr.msra.gmra.mxu1 %vm4609_vm5, %v2179_v40 }
 0x334   : > { %2224 = vmatpush.msrb.mxu3 %v2097_v15 }
 0x335   : > { %2489 = vmatmul.msk.f32.vlgmr.msrb.gmra.mxu3 %vm4610_vm4, %v2179_v40 }
 0x34e   : > { %v2116_v52 = vpop.f32.mrf.mxu3 }
 0x34f   : > { %v2117_v44 = vadd.f32 %v2116_v52, %v2013_v26 }
 0x35a   : > { %v2136_v56 = vpop.f32.mrf.mxu1 }
 0x35b   : > { %v2137_v47 = vadd.f32 %v2136_v56, %v2117_v44 }
 0x35d   : > { %2244 = vmatpush.msrb.mxu1 %v2137_v47 }
 0x35e   : > { %2490 = vmatmul.msk.f32.vlgmr.msrb.gmra.mxu1 %vm4611_vm3, %v2179_v40 }
 0x360   : > { %v2176_v10 = vpop.f32.mrf.mxu0 }
 0x361   : > { %v2177_v1 = vadd.f32 %v2176_v10, %v2157_v2 }
 0x363   : > { %2264 = vmatpush.msra.mxu0 %v2177_v1 }
 0x364   : > { %2491 = vmatmul.msk.f32.vlgmr.msra.gmra.mxu0 %vm4612_vm9, %v2179_v40 }
 0x3af   : > { %v2206_v20 = vpop.f32.mrf.mxu1 }
 0x3b0   : > { %v2207_v28 = vadd.f32 %v2206_v20, %v2184_v62 }
 0x3b2   : > { %v2280_v4 = vadd.f32 %v2272_v0, %v2207_v28 }
 0x3b8   : > { %v2226_v48 = vpop.f32.mrf.mxu3 }
 0x3b9   : > { %v2227_v6 = vadd.f32 %v2226_v48, %v2184_v62 }
 0x3bb   : > { %v2281_v39 = vadd.f32 %v2273_v9, %v2227_v6 }
 0x3bd   : > { %v2288_v42 = vrot.slane %v2281_v39, 4 }
 0x3bf   : > { %v2290_v54 = vsel %vm4613_vm8, %v2280_v4, %v2288_v42 }
 0x3c0   : > { %2294 = vst [vmem:[%s500_s21] sm:$0xff] %v2290_v54 }
 0x3db   : > { %v2246_v53 = vpop.f32.mrf.mxu1 }
 0x3dc   : > { %v2247_v11 = vadd.f32 %v2246_v53, %v2184_v62 }
 0x3de   : > { %v2282_v21 = vadd.f32 %v2274_v24, %v2247_v11 }
 0x3e1   : > { %v2266_v61 = vpop.f32.mrf.mxu0 }
 0x3e2   : > { %v2267_v14 = vadd.f32 %v2266_v61, %v2184_v62 }
 0x3e4   : > { %v2283_v59 = vadd.f32 %v2275_v41, %v2267_v14 }
 0x3e6   : > { %v2289_v38 = vrot.slane %v2283_v59, 4 }
 0x3e8   : > { %v2291_v32 = vsel %vm4616_vm13, %v2282_v21, %v2289_v38 }
 0x3e9   : > { %2295 = vst [vmem:[%s500_s21 + $0x8] sm:$0xff] %v2291_v32 }
 0x3ea   : > { %2880 = shalt.err (!%p2877_p4)
}
 0x3eb   : > { %2612 = dma.vmem_to_hbm [thread:$0]  (%p4617_p6), %s2311_s12, 256, %s2313_s13, %s2297_s23  }
 0x3ec PF: > { %s4618_s22 = sld [smem:[#allocation20_spill]] }
 0x3ed   : > { %s4619_s9 = sld [smem:[#allocation27_spill]] }
 0x3ee   : > { %s4620_s26 = sld [smem:[#allocation22_spill]] }
 0x3f2   : > { %s2324_s18 = sand.u32 1, %s4618_s22  }
 0x3f3   : > { %p4621_p1 = scmp.ne.s32.totalorder %s4619_s9, 0  ;;  %s2325_s8 = scalar_lea.sflag [#allocation6], %s2324_s18 }
 0x3f4   : > { %p4622_p12 = scmp.ge.s32.totalorder %s4620_s26, 2 }
 0x3f6   : > { %p2628_p13 = pnand %p4622_p12, %p4621_p1 }
 0x3f8   : > { %p2629_p2 = pneg %p2628_p13 }
 0x3fa   : > { %2938 = dma.done.wait (%p2629_p2), %s2325_s8, 256  }
 0x3fb   : > { %2940 = vsyncadd (%p2629_p2), %s2325_s8, 4294967040  ;;  %s4623_s22 = sld [smem:[#allocation23_spill]]  ;;  %s4630_s13 = smov %s2947_s14 }
 0x3fc   : > { %s4624_s19 = sld [smem:[#allocation18_spill]]  ;;  %s4632_s16 = smov %s2959_s17 }
 0x3fd   : > { %s4625_s15 = sld [smem:[#allocation28_spill]] }
 0x3fe   : > { %s4626_s21 = sld [smem:[#allocation19_spill]] }
 0x3ff   : > { %s4627_s18 = sld [smem:[#allocation24_spill]] }
 0x400   : > { %s4628_s11 = sld [smem:[#allocation21_spill]] }
 0x401   : > { %s4629_s0 = sld [smem:[#allocation25_spill]]  ;;  %p29_p3 = scmp.ge.s32.totalorder %s4623_s22, 4  }
 0x402   : > { %s4631_s14 = smov %s4624_s19  ;;  %s4634_s19 = smov %s2971_s20 }
 0x403   :  { %31 = sbr.rel (!%p29_p3) target bundleno = 20 (0x14), region = 146 }
 0x404   : > { %s4633_s17 = smov %s4626_s21 }
 0x406   : > { %s4635_s20 = smov %s4628_s11 }
 0x407   : > { %s4636_s21 = smov %s4629_s0 }
 0x408   :  { %2331 = vsyncpa [#allocation5], 1 }
 0x409   :  { %2333 = vsyncpa [#allocation5 + $0x1], 1 }
 0x40a   :  { %2334 = vsyncpa [#allocation8], 1 }
 0x40b   :  { %2336 = vsyncpa [#allocation8 + $0x1], 1 }
 0x40c   :  { %2337 = vsyncpa [#allocation11], 1 }
 0x40d   :  { %2339 = vsyncpa [#allocation11 + $0x1], 1 }
 0x40e   :  { %2340 = vsyncpa [#allocation6], 1 }
 0x40f   :  { %2342 = vsyncpa [#allocation6 + $0x1], 1 }

</bundles_post_ra>
